<compile_context>
chip_gen: v6e
topology: v6e:2x2x1
jax: 0.10.0
libtpu: 0.0.40
codegen_flags: <defaults>
</compile_context>

<pallas_src>
import jax
import jax.numpy as jnp
from jax.experimental import pallas as pl
from jax.experimental.pallas import tpu as pltpu

EPS = 1e-5
_MAX_ROWS_PER_STEP = 32            # pass-1 output rows per grid step (unrolled loop)
_VMEM_BUDGET = 24 * 1024 * 1024    # target footprint of double-buffered tiles
_VMEM_LIMIT = 48 * 1024 * 1024     # scoped VMEM limit (~75% of v7x's 64 MiB)


def _choose_row_tile(Ho, C_in, C_out, W, Wo):
    """Output rows per pass-1 grid step: multiple of 8 (sublane tiling) or == Ho."""
    per_row = 16 * C_in * W + 8 * C_out * Wo            # f32 in+out, x2 buffers
    t = max(8, int(_VMEM_BUDGET // max(per_row, 1)) // 8 * 8)
    t = min(t, _MAX_ROWS_PER_STEP)                      # body is statically unrolled
    return Ho if Ho <= t else t


def _choose_lane_tile(S, C_out):
    """Flattened-spatial lane tile for pass 2: multiple of 128, or full S."""
    max_ts = int(_VMEM_BUDGET // (16 * C_out))          # f32 in+out, x2 buffers
    if S <= max_ts:
        return S
    ts = max(128, min(max_ts, 8192))
    return ts // 128 * 128


def _make_pass1_kernel(C_half, W, Wo, tho, Ho, select_first):
    """ReLU + fused stride-2 gather + two dense 1x1 convs + y store + BN stats."""
    needs_row_mask = (Ho % tho) != 0

    def kernel(x_ref, w1_ref, w2_ref, pe_ref, po_ref, y_ref, sum_ref, sq_ref):
        # x_ref : (1, C_in, tho, 2W)  row r = [even H-row | odd H-row] of x
        # w*_ref: (C_half, C_in)      dense 1x1-conv weights
        # p*_ref: (W, Wo)             0/1 column-selection matrices (even / odd W)
        # y_ref : (1, C_out, tho, Wo) pre-BN conv output ("store-y")
        # sum_ref, sq_ref: (1, C_out, 1) per-batch running sum / sum of squares
        h = pl.program_id(1)

        @pl.when(h == 0)
        def _():
            sum_ref[...] = jnp.zeros_like(sum_ref)
            sq_ref[...] = jnp.zeros_like(sq_ref)

        w1 = w1_ref[...]
        w2 = w2_ref[...]
        pe = pe_ref[...]
        po = po_ref[...]

        s1 = jnp.zeros((C_half, 1), jnp.float32)
        s2 = jnp.zeros((C_half, 1), jnp.float32)
        q1 = jnp.zeros((C_half, 1), jnp.float32)
        q2 = jnp.zeros((C_half, 1), jnp.float32)
        row0 = h * tho

        for r in range(tho):                                  # static unroll
            xr = jnp.maximum(x_ref[0, :, r, :], 0.0)          # (C_in, 2W), ReLU
            xe = xr[:, :W]                                    # even H-row
            xo = xr[:, W:]                                    # odd  H-row
            if select_first:
                y1 = jnp.dot(w1, jnp.dot(xe, pe, preferred_element_type=jnp.float32),
                             preferred_element_type=jnp.float32)        # (C_half, Wo)
                y2 = jnp.dot(w2, jnp.dot(xo, po, preferred_element_type=jnp.float32),
                             preferred_element_type=jnp.float32)
            else:
                y1 = jnp.dot(jnp.dot(w1, xe, preferred_element_type=jnp.float32), pe,
                             preferred_element_type=jnp.float32)
                y2 = jnp.dot(jnp.dot(w2, xo, preferred_element_type=jnp.float32), po,
                             preferred_element_type=jnp.float32)

            y_ref[0, :C_half, r, :] = y1                      # conv_1 channels
            y_ref[0, C_half:, r, :] = y2                      # conv_2 channels

            if needs_row_mask:                                # edge tile of Ho
                valid = (row0 + r) < Ho
                y1 = jnp.where(valid, y1, 0.0)
                y2 = jnp.where(valid, y2, 0.0)
            s1 += jnp.sum(y1, axis=1, keepdims=True)
            s2 += jnp.sum(y2, axis=1, keepdims=True)
            q1 += jnp.sum(y1 * y1, axis=1, keepdims=True)
            q2 += jnp.sum(y2 * y2, axis=1, keepdims=True)

        sum_ref[0, :C_half, :] += s1
        sum_ref[0, C_half:, :] += s2
        sq_ref[0, :C_half, :] += q1
        sq_ref[0, C_half:, :] += q2

    return kernel


def _affine_kernel(y_ref, scale_ref, shift_ref, o_ref):
    # Lane-dense folded-BN affine: out = y * scale + shift.
    o_ref[0] = y_ref[0] * scale_ref[...] + shift_ref[...]


def factorized_reduce(x, w1, w2, gamma, beta):
    """x: (N, C_in, H, W) f32 NCHW -> (N, C_out, H//2, W//2), training-mode BN."""
    N, C_in, H, W = x.shape
    C_half = w1.shape[0]
    C_out = 2 * C_half
    assert H % 2 == 0 and W % 2 == 0, "even spatial dims assumed (as in module usage)"
    Ho, Wo = H // 2, W // 2
    S = Ho * Wo

    x = x.astype(jnp.float32)
    # Free reshape (no data movement): output row r sees its even/odd input
    # H-row pair contiguously on the lane axis -> plain rectangular HBM DMA.
    x6 = x.reshape(N, C_in, Ho, 2 * W)

    w1m = w1.reshape(C_half, C_in).astype(jnp.float32)
    w2m = w2.reshape(C_half, C_in).astype(jnp.float32)

    # Exact 0/1 selection matrices for the even / odd W-column picks.
    widx = jnp.arange(W, dtype=jnp.int32)[:, None]
    jidx = jnp.arange(Wo, dtype=jnp.int32)[None, :]
    pe = (widx == 2 * jidx).astype(jnp.float32)               # (W, Wo)
    po = (widx == 2 * jidx + 1).astype(jnp.float32)           # (W, Wo)

    # Statically pick the cheaper contraction order (MXU MACs per row).
    cost_select_first = C_in * W * Wo + C_half * C_in * Wo
    cost_conv_first = C_half * C_in * W + C_half * W * Wo
    select_first = cost_select_first <= cost_conv_first

    tho = _choose_row_tile(Ho, C_in, C_out, W, Wo)
    n_h = (Ho + tho - 1) // tho

    # ---- pass 1: relu -> gather -> convs -> y + per-batch sum / sumsq --------
    y4, psum, psq = pl.pallas_call(
        _make_pass1_kernel(C_half, W, Wo, tho, Ho, select_first),
        out_shape=(jax.ShapeDtypeStruct((N, C_out, Ho, Wo), jnp.float32),
                   jax.ShapeDtypeStruct((N, C_out, 1), jnp.float32),
                   jax.ShapeDtypeStruct((N, C_out, 1), jnp.float32)),
        grid_spec=pltpu.PrefetchScalarGridSpec(
            num_scalar_prefetch=0,
            grid=(N, n_h),
            in_specs=[
                pl.BlockSpec((1, C_in, tho, 2 * W), lambda n, h: (n, 0, h, 0)),
                pl.BlockSpec((C_half, C_in), lambda n, h: (0, 0)),
                pl.BlockSpec((C_half, C_in), lambda n, h: (0, 0)),
                pl.BlockSpec((W, Wo), lambda n, h: (0, 0)),
                pl.BlockSpec((W, Wo), lambda n, h: (0, 0)),
            ],
            out_specs=[
                pl.BlockSpec((1, C_out, tho, Wo), lambda n, h: (n, 0, h, 0)),
                pl.BlockSpec((1, C_out, 1), lambda n, h: (n, 0, 0)),
                pl.BlockSpec((1, C_out, 1), lambda n, h: (n, 0, 0)),
            ]),
        compiler_params=pltpu.CompilerParams(
            dimension_semantics=("parallel", "arbitrary"),
            vmem_limit_bytes=_VMEM_LIMIT),
    )(x6, w1m, w2m, pe, po)

    # ---- fold BN (batch mean, biased var) + affine into scale/shift ----------
    cnt = jnp.float32(N * S)
    sums = jnp.sum(psum, axis=0)                              # (C_out, 1)
    sqs = jnp.sum(psq, axis=0)
    mean = sums / cnt
    # TODO(synk): E[y^2]-E[y]^2 in f32 can cancel for very large N*S with
    # |mean| >> std; a shifted/Welford accumulation would be more robust.
    var = jnp.maximum(sqs / cnt - mean * mean, 0.0)
    scale = gamma.reshape(C_out, 1).astype(jnp.float32) * jax.lax.rsqrt(var + EPS)
    shift = beta.reshape(C_out, 1).astype(jnp.float32) - mean * scale

    # ---- pass 2: lane-dense affine over flattened spatial (free reshapes) ----
    y3 = y4.reshape(N, C_out, S)
    ts = _choose_lane_tile(S, C_out)
    n_s = (S + ts - 1) // ts

    out = pl.pallas_call(
        _affine_kernel,
        out_shape=jax.ShapeDtypeStruct((N, C_out, S), jnp.float32),
        grid_spec=pltpu.PrefetchScalarGridSpec(
            num_scalar_prefetch=0,
            grid=(N, n_s),
            in_specs=[
                pl.BlockSpec((1, C_out, ts), lambda n, s: (n, 0, s)),
                pl.BlockSpec((C_out, 1), lambda n, s: (0, 0)),
                pl.BlockSpec((C_out, 1), lambda n, s: (0, 0)),
            ],
            out_specs=pl.BlockSpec((1, C_out, ts), lambda n, s: (n, 0, s))),
        compiler_params=pltpu.CompilerParams(
            dimension_semantics=("parallel", "parallel"),
            vmem_limit_bytes=_VMEM_LIMIT),
    )(y3, scale, shift)

    return out.reshape(N, C_out, Ho, Wo)


def factorized_reduce_ref(x, w1, w2, gamma, beta):
    """Pure-JAX reference mirroring the PyTorch forward (training-mode BN)."""
    xr = jnp.maximum(x, 0.0)
    C_half, C_in = w1.shape[0], w1.shape[1]
    x1 = xr[:, :, 0::2, 0::2]
    x2 = xr[:, :, 1::2, 1::2]
    y1 = jnp.einsum('nchw,oc->nohw', x1, w1.reshape(C_half, C_in))
    y2 = jnp.einsum('nchw,oc->nohw', x2, w2.reshape(C_half, C_in))
    y = jnp.concatenate([y1, y2], axis=1)
    mean = jnp.mean(y, axis=(0, 2, 3), keepdims=True)
    var = jnp.mean((y - mean) ** 2, axis=(0, 2, 3), keepdims=True)
    y_hat = (y - mean) / jnp.sqrt(var + EPS)
    return y_hat * gamma.reshape(1, -1, 1, 1) + beta.reshape(1, -1, 1, 1)


if __name__ == "__main__":
    N, C_in, H, W = 2, 4, 16, 16
    C_out = 8
    C_half = C_out // 2

    key = jax.random.PRNGKey(0)
    kx, k1, k2, kg, kb = jax.random.split(key, 5)
    x = jax.random.normal(kx, (N, C_in, H, W), dtype=jnp.float32)
    w1 = 0.1 * jax.random.normal(k1, (C_half, C_in, 1, 1), dtype=jnp.float32)
    w2 = 0.1 * jax.random.normal(k2, (C_half, C_in, 1, 1), dtype=jnp.float32)
    gamma = 1.0 + 0.1 * jax.random.normal(kg, (C_out,), dtype=jnp.float32)
    beta = 0.1 * jax.random.normal(kb, (C_out,), dtype=jnp.float32)

    fr = jax.jit(factorized_reduce)
    out = jax.block_until_ready(fr(x, w1, w2, gamma, beta))

    ref = factorized_reduce_ref(x, w1, w2, gamma, beta)
    assert out.shape == (N, C_out, H // 2, W // 2)
    assert bool(jnp.allclose(out, ref, atol=2e-4, rtol=2e-4))

    print("KERNEL_OK")
</pallas_src>

<mosaic_0001>
module attributes {stable_mosaic.version = 11 : i64} {
  func.func @kernel(%arg0: i32, %arg1: i32, %arg2: memref<1x4x8x32xf32, #tpu.memory_space<vmem>>, %arg3: memref<4x4xf32, #tpu.memory_space<vmem>>, %arg4: memref<4x4xf32, #tpu.memory_space<vmem>>, %arg5: memref<16x8xf32, #tpu.memory_space<vmem>>, %arg6: memref<16x8xf32, #tpu.memory_space<vmem>>, %arg7: memref<1x8x8x8xf32, #tpu.memory_space<vmem>>, %arg8: memref<1x8x1xf32, #tpu.memory_space<vmem>>, %arg9: memref<1x8x1xf32, #tpu.memory_space<vmem>>) attributes {dimension_semantics = [#tpu.dimension_semantics<parallel>, #tpu.dimension_semantics<arbitrary>], iteration_bounds = array<i64: 2, 1>, scalar_prefetch = 0 : i64, scratch_operands = 0 : i64, tpu.core_type = #tpu.core_type<tc>, window_params = [{transform_indices = @transform_0, window_bounds = array<i64: 1, 4, 8, 32>}, {pipeline_mode = #tpu.pipeline_mode<synchronous>, transform_indices = @transform_1, window_bounds = array<i64: 4, 4>}, {pipeline_mode = #tpu.pipeline_mode<synchronous>, transform_indices = @transform_2, window_bounds = array<i64: 4, 4>}, {pipeline_mode = #tpu.pipeline_mode<synchronous>, transform_indices = @transform_3, window_bounds = array<i64: 16, 8>}, {pipeline_mode = #tpu.pipeline_mode<synchronous>, transform_indices = @transform_4, window_bounds = array<i64: 16, 8>}, {transform_indices = @transform_5, window_bounds = array<i64: 1, 8, 8, 8>}, {transform_indices = @transform_6, window_bounds = array<i64: 1, 8, 1>}, {transform_indices = @transform_7, window_bounds = array<i64: 1, 8, 1>}]} {
    %c0_i32 = arith.constant 0 : i32
    %0 = arith.cmpi eq, %arg1, %c0_i32 : i32
    %1 = arith.extui %0 : i1 to i32
    %c0_i32_0 = arith.constant 0 : i32
    %2 = arith.cmpi ne, %1, %c0_i32_0 : i32
    scf.if %2 {
      %cst_196 = arith.constant 0.000000e+00 : f32
      %275 = vector.broadcast %cst_196 : f32 to vector<1x8x1xf32>
      %c0_197 = arith.constant 0 : index
      %c0_198 = arith.constant 0 : index
      %c0_199 = arith.constant 0 : index
      %276 = vector.load %arg8[%c0_197, %c0_198, %c0_199] : memref<1x8x1xf32, #tpu.memory_space<vmem>>, vector<1x8x1xf32>
      tpu.vector_store %arg8[%c0_197, %c0_198, %c0_199], %275 {strides = array<i32>} : memref<1x8x1xf32, #tpu.memory_space<vmem>>, vector<1x8x1xf32>,
      %cst_200 = arith.constant 0.000000e+00 : f32
      %277 = vector.broadcast %cst_200 : f32 to vector<1x8x1xf32>
      %c0_201 = arith.constant 0 : index
      %c0_202 = arith.constant 0 : index
      %c0_203 = arith.constant 0 : index
      %278 = vector.load %arg9[%c0_201, %c0_202, %c0_203] : memref<1x8x1xf32, #tpu.memory_space<vmem>>, vector<1x8x1xf32>
      tpu.vector_store %arg9[%c0_201, %c0_202, %c0_203], %277 {strides = array<i32>} : memref<1x8x1xf32, #tpu.memory_space<vmem>>, vector<1x8x1xf32>,
    } else {
    }
    %c0 = arith.constant 0 : index
    %c0_1 = arith.constant 0 : index
    %3 = vector.load %arg3[%c0, %c0_1] : memref<4x4xf32, #tpu.memory_space<vmem>>, vector<4x4xf32>
    %c0_2 = arith.constant 0 : index
    %c0_3 = arith.constant 0 : index
    %4 = vector.load %arg4[%c0_2, %c0_3] : memref<4x4xf32, #tpu.memory_space<vmem>>, vector<4x4xf32>
    %c0_4 = arith.constant 0 : index
    %c0_5 = arith.constant 0 : index
    %5 = vector.load %arg5[%c0_4, %c0_5] : memref<16x8xf32, #tpu.memory_space<vmem>>, vector<16x8xf32>
    %c0_6 = arith.constant 0 : index
    %c0_7 = arith.constant 0 : index
    %6 = vector.load %arg6[%c0_6, %c0_7] : memref<16x8xf32, #tpu.memory_space<vmem>>, vector<16x8xf32>
    %cst = arith.constant 0.000000e+00 : f32
    %7 = vector.broadcast %cst : f32 to vector<4x1xf32>
    %cst_8 = arith.constant 0.000000e+00 : f32
    %8 = vector.broadcast %cst_8 : f32 to vector<4x1xf32>
    %cst_9 = arith.constant 0.000000e+00 : f32
    %9 = vector.broadcast %cst_9 : f32 to vector<4x1xf32>
    %cst_10 = arith.constant 0.000000e+00 : f32
    %10 = vector.broadcast %cst_10 : f32 to vector<4x1xf32>
    %c0_11 = arith.constant 0 : index
    %c0_12 = arith.constant 0 : index
    %c0_13 = arith.constant 0 : index
    %c0_14 = arith.constant 0 : index
    %11 = vector.load %arg2[%c0_11, %c0_12, %c0_13, %c0_14] : memref<1x4x8x32xf32, #tpu.memory_space<vmem>>, vector<1x4x1x32xf32>
    %12 = vector.shape_cast %11 : vector<1x4x1x32xf32> to vector<4x32xf32>
    %cst_15 = arith.constant 0.000000e+00 : f32
    %13 = vector.broadcast %cst_15 : f32 to vector<4x32xf32>
    %14 = arith.maximumf %12, %13 : vector<4x32xf32>
    %15 = vector.extract_strided_slice %14 {offsets = [0, 0], sizes = [4, 16], strides = [1, 1]} : vector<4x32xf32> to vector<4x16xf32>
    %16 = vector.extract_strided_slice %14 {offsets = [0, 16], sizes = [4, 16], strides = [1, 1]} : vector<4x32xf32> to vector<4x16xf32>
    %cst_16 = arith.constant dense<0.000000e+00> : vector<4x8xf32>
    %17 = tpu.matmul %15, %5, %cst_16 {dimension_numbers = #tpu.dot_dimension_numbers<[1], [0], [0], [1], [0, 0, 1, 1], [], []>} : vector<4x16xf32>, vector<16x8xf32>, vector<4x8xf32> -> vector<4x8xf32>
    %cst_17 = arith.constant dense<0.000000e+00> : vector<4x8xf32>
    %18 = tpu.matmul %3, %17, %cst_17 {dimension_numbers = #tpu.dot_dimension_numbers<[1], [0], [0], [1], [0, 0, 1, 1], [], []>} : vector<4x4xf32>, vector<4x8xf32>, vector<4x8xf32> -> vector<4x8xf32>
    %cst_18 = arith.constant dense<0.000000e+00> : vector<4x8xf32>
    %19 = tpu.matmul %16, %6, %cst_18 {dimension_numbers = #tpu.dot_dimension_numbers<[1], [0], [0], [1], [0, 0, 1, 1], [], []>} : vector<4x16xf32>, vector<16x8xf32>, vector<4x8xf32> -> vector<4x8xf32>
    %cst_19 = arith.constant dense<0.000000e+00> : vector<4x8xf32>
    %20 = tpu.matmul %4, %19, %cst_19 {dimension_numbers = #tpu.dot_dimension_numbers<[1], [0], [0], [1], [0, 0, 1, 1], [], []>} : vector<4x4xf32>, vector<4x8xf32>, vector<4x8xf32> -> vector<4x8xf32>
    %c0_20 = arith.constant 0 : index
    %c0_21 = arith.constant 0 : index
    %c0_22 = arith.constant 0 : index
    %c0_23 = arith.constant 0 : index
    %21 = vector.load %arg7[%c0_20, %c0_21, %c0_22, %c0_23] : memref<1x8x8x8xf32, #tpu.memory_space<vmem>>, vector<1x4x1x8xf32>
    %22 = vector.shape_cast %21 : vector<1x4x1x8xf32> to vector<4x8xf32>
    %23 = vector.shape_cast %18 : vector<4x8xf32> to vector<1x4x1x8xf32>
    tpu.vector_store %arg7[%c0_20, %c0_21, %c0_22, %c0_23], %23 {strides = array<i32>} : memref<1x8x8x8xf32, #tpu.memory_space<vmem>>, vector<1x4x1x8xf32>,
    %c0_24 = arith.constant 0 : index
    %c4 = arith.constant 4 : index
    %c0_25 = arith.constant 0 : index
    %c0_26 = arith.constant 0 : index
    %24 = vector.load %arg7[%c0_24, %c4, %c0_25, %c0_26] : memref<1x8x8x8xf32, #tpu.memory_space<vmem>>, vector<1x4x1x8xf32>
    %25 = vector.shape_cast %24 : vector<1x4x1x8xf32> to vector<4x8xf32>
    %26 = vector.shape_cast %20 : vector<4x8xf32> to vector<1x4x1x8xf32>
    tpu.vector_store %arg7[%c0_24, %c4, %c0_25, %c0_26], %26 {strides = array<i32>} : memref<1x8x8x8xf32, #tpu.memory_space<vmem>>, vector<1x4x1x8xf32>,
    %cst_27 = arith.constant dense<0.000000e+00> : vector<4xf32>
    %27 = vector.multi_reduction <add>, %18, %cst_27 [1] : vector<4x8xf32> to vector<4xf32>
    %28 = vector.shape_cast %27 : vector<4xf32> to vector<4x1xf32>
    %29 = arith.addf %7, %28 : vector<4x1xf32>
    %cst_28 = arith.constant dense<0.000000e+00> : vector<4xf32>
    %30 = vector.multi_reduction <add>, %20, %cst_28 [1] : vector<4x8xf32> to vector<4xf32>
    %31 = vector.shape_cast %30 : vector<4xf32> to vector<4x1xf32>
    %32 = arith.addf %8, %31 : vector<4x1xf32>
    %33 = arith.mulf %18, %18 : vector<4x8xf32>
    %cst_29 = arith.constant dense<0.000000e+00> : vector<4xf32>
    %34 = vector.multi_reduction <add>, %33, %cst_29 [1] : vector<4x8xf32> to vector<4xf32>
    %35 = vector.shape_cast %34 : vector<4xf32> to vector<4x1xf32>
    %36 = arith.addf %9, %35 : vector<4x1xf32>
    %37 = arith.mulf %20, %20 : vector<4x8xf32>
    %cst_30 = arith.constant dense<0.000000e+00> : vector<4xf32>
    %38 = vector.multi_reduction <add>, %37, %cst_30 [1] : vector<4x8xf32> to vector<4xf32>
    %39 = vector.shape_cast %38 : vector<4xf32> to vector<4x1xf32>
    %40 = arith.addf %10, %39 : vector<4x1xf32>
    %c0_31 = arith.constant 0 : index
    %c0_32 = arith.constant 0 : index
    %c1 = arith.constant 1 : index
    %c0_33 = arith.constant 0 : index
    %41 = vector.load %arg2[%c0_31, %c0_32, %c1, %c0_33] : memref<1x4x8x32xf32, #tpu.memory_space<vmem>>, vector<1x4x1x32xf32>
    %42 = vector.shape_cast %41 : vector<1x4x1x32xf32> to vector<4x32xf32>
    %cst_34 = arith.constant 0.000000e+00 : f32
    %43 = vector.broadcast %cst_34 : f32 to vector<4x32xf32>
    %44 = arith.maximumf %42, %43 : vector<4x32xf32>
    %45 = vector.extract_strided_slice %44 {offsets = [0, 0], sizes = [4, 16], strides = [1, 1]} : vector<4x32xf32> to vector<4x16xf32>
    %46 = vector.extract_strided_slice %44 {offsets = [0, 16], sizes = [4, 16], strides = [1, 1]} : vector<4x32xf32> to vector<4x16xf32>
    %cst_35 = arith.constant dense<0.000000e+00> : vector<4x8xf32>
    %47 = tpu.matmul %45, %5, %cst_35 {dimension_numbers = #tpu.dot_dimension_numbers<[1], [0], [0], [1], [0, 0, 1, 1], [], []>} : vector<4x16xf32>, vector<16x8xf32>, vector<4x8xf32> -> vector<4x8xf32>
    %cst_36 = arith.constant dense<0.000000e+00> : vector<4x8xf32>
    %48 = tpu.matmul %3, %47, %cst_36 {dimension_numbers = #tpu.dot_dimension_numbers<[1], [0], [0], [1], [0, 0, 1, 1], [], []>} : vector<4x4xf32>, vector<4x8xf32>, vector<4x8xf32> -> vector<4x8xf32>
    %cst_37 = arith.constant dense<0.000000e+00> : vector<4x8xf32>
    %49 = tpu.matmul %46, %6, %cst_37 {dimension_numbers = #tpu.dot_dimension_numbers<[1], [0], [0], [1], [0, 0, 1, 1], [], []>} : vector<4x16xf32>, vector<16x8xf32>, vector<4x8xf32> -> vector<4x8xf32>
    %cst_38 = arith.constant dense<0.000000e+00> : vector<4x8xf32>
    %50 = tpu.matmul %4, %49, %cst_38 {dimension_numbers = #tpu.dot_dimension_numbers<[1], [0], [0], [1], [0, 0, 1, 1], [], []>} : vector<4x4xf32>, vector<4x8xf32>, vector<4x8xf32> -> vector<4x8xf32>
    %c0_39 = arith.constant 0 : index
    %c0_40 = arith.constant 0 : index
    %c1_41 = arith.constant 1 : index
    %c0_42 = arith.constant 0 : index
    %51 = vector.load %arg7[%c0_39, %c0_40, %c1_41, %c0_42] : memref<1x8x8x8xf32, #tpu.memory_space<vmem>>, vector<1x4x1x8xf32>
    %52 = vector.shape_cast %51 : vector<1x4x1x8xf32> to vector<4x8xf32>
    %53 = vector.shape_cast %48 : vector<4x8xf32> to vector<1x4x1x8xf32>
    tpu.vector_store %arg7[%c0_39, %c0_40, %c1_41, %c0_42], %53 {strides = array<i32>} : memref<1x8x8x8xf32, #tpu.memory_space<vmem>>, vector<1x4x1x8xf32>,
    %c0_43 = arith.constant 0 : index
    %c4_44 = arith.constant 4 : index
    %c1_45 = arith.constant 1 : index
    %c0_46 = arith.constant 0 : index
    %54 = vector.load %arg7[%c0_43, %c4_44, %c1_45, %c0_46] : memref<1x8x8x8xf32, #tpu.memory_space<vmem>>, vector<1x4x1x8xf32>
    %55 = vector.shape_cast %54 : vector<1x4x1x8xf32> to vector<4x8xf32>
    %56 = vector.shape_cast %50 : vector<4x8xf32> to vector<1x4x1x8xf32>
    tpu.vector_store %arg7[%c0_43, %c4_44, %c1_45, %c0_46], %56 {strides = array<i32>} : memref<1x8x8x8xf32, #tpu.memory_space<vmem>>, vector<1x4x1x8xf32>,
    %cst_47 = arith.constant dense<0.000000e+00> : vector<4xf32>
    %57 = vector.multi_reduction <add>, %48, %cst_47 [1] : vector<4x8xf32> to vector<4xf32>
    %58 = vector.shape_cast %57 : vector<4xf32> to vector<4x1xf32>
    %59 = arith.addf %29, %58 : vector<4x1xf32>
    %cst_48 = arith.constant dense<0.000000e+00> : vector<4xf32>
    %60 = vector.multi_reduction <add>, %50, %cst_48 [1] : vector<4x8xf32> to vector<4xf32>
    %61 = vector.shape_cast %60 : vector<4xf32> to vector<4x1xf32>
    %62 = arith.addf %32, %61 : vector<4x1xf32>
    %63 = arith.mulf %48, %48 : vector<4x8xf32>
    %cst_49 = arith.constant dense<0.000000e+00> : vector<4xf32>
    %64 = vector.multi_reduction <add>, %63, %cst_49 [1] : vector<4x8xf32> to vector<4xf32>
    %65 = vector.shape_cast %64 : vector<4xf32> to vector<4x1xf32>
    %66 = arith.addf %36, %65 : vector<4x1xf32>
    %67 = arith.mulf %50, %50 : vector<4x8xf32>
    %cst_50 = arith.constant dense<0.000000e+00> : vector<4xf32>
    %68 = vector.multi_reduction <add>, %67, %cst_50 [1] : vector<4x8xf32> to vector<4xf32>
    %69 = vector.shape_cast %68 : vector<4xf32> to vector<4x1xf32>
    %70 = arith.addf %40, %69 : vector<4x1xf32>
    %c0_51 = arith.constant 0 : index
    %c0_52 = arith.constant 0 : index
    %c2 = arith.constant 2 : index
    %c0_53 = arith.constant 0 : index
    %71 = vector.load %arg2[%c0_51, %c0_52, %c2, %c0_53] : memref<1x4x8x32xf32, #tpu.memory_space<vmem>>, vector<1x4x1x32xf32>
    %72 = vector.shape_cast %71 : vector<1x4x1x32xf32> to vector<4x32xf32>
    %cst_54 = arith.constant 0.000000e+00 : f32
    %73 = vector.broadcast %cst_54 : f32 to vector<4x32xf32>
    %74 = arith.maximumf %72, %73 : vector<4x32xf32>
    %75 = vector.extract_strided_slice %74 {offsets = [0, 0], sizes = [4, 16], strides = [1, 1]} : vector<4x32xf32> to vector<4x16xf32>
    %76 = vector.extract_strided_slice %74 {offsets = [0, 16], sizes = [4, 16], strides = [1, 1]} : vector<4x32xf32> to vector<4x16xf32>
    %cst_55 = arith.constant dense<0.000000e+00> : vector<4x8xf32>
    %77 = tpu.matmul %75, %5, %cst_55 {dimension_numbers = #tpu.dot_dimension_numbers<[1], [0], [0], [1], [0, 0, 1, 1], [], []>} : vector<4x16xf32>, vector<16x8xf32>, vector<4x8xf32> -> vector<4x8xf32>
    %cst_56 = arith.constant dense<0.000000e+00> : vector<4x8xf32>
    %78 = tpu.matmul %3, %77, %cst_56 {dimension_numbers = #tpu.dot_dimension_numbers<[1], [0], [0], [1], [0, 0, 1, 1], [], []>} : vector<4x4xf32>, vector<4x8xf32>, vector<4x8xf32> -> vector<4x8xf32>
    %cst_57 = arith.constant dense<0.000000e+00> : vector<4x8xf32>
    %79 = tpu.matmul %76, %6, %cst_57 {dimension_numbers = #tpu.dot_dimension_numbers<[1], [0], [0], [1], [0, 0, 1, 1], [], []>} : vector<4x16xf32>, vector<16x8xf32>, vector<4x8xf32> -> vector<4x8xf32>
    %cst_58 = arith.constant dense<0.000000e+00> : vector<4x8xf32>
    %80 = tpu.matmul %4, %79, %cst_58 {dimension_numbers = #tpu.dot_dimension_numbers<[1], [0], [0], [1], [0, 0, 1, 1], [], []>} : vector<4x4xf32>, vector<4x8xf32>, vector<4x8xf32> -> vector<4x8xf32>
    %c0_59 = arith.constant 0 : index
    %c0_60 = arith.constant 0 : index
    %c2_61 = arith.constant 2 : index
    %c0_62 = arith.constant 0 : index
    %81 = vector.load %arg7[%c0_59, %c0_60, %c2_61, %c0_62] : memref<1x8x8x8xf32, #tpu.memory_space<vmem>>, vector<1x4x1x8xf32>
    %82 = vector.shape_cast %81 : vector<1x4x1x8xf32> to vector<4x8xf32>
    %83 = vector.shape_cast %78 : vector<4x8xf32> to vector<1x4x1x8xf32>
    tpu.vector_store %arg7[%c0_59, %c0_60, %c2_61, %c0_62], %83 {strides = array<i32>} : memref<1x8x8x8xf32, #tpu.memory_space<vmem>>, vector<1x4x1x8xf32>,
    %c0_63 = arith.constant 0 : index
    %c4_64 = arith.constant 4 : index
    %c2_65 = arith.constant 2 : index
    %c0_66 = arith.constant 0 : index
    %84 = vector.load %arg7[%c0_63, %c4_64, %c2_65, %c0_66] : memref<1x8x8x8xf32, #tpu.memory_space<vmem>>, vector<1x4x1x8xf32>
    %85 = vector.shape_cast %84 : vector<1x4x1x8xf32> to vector<4x8xf32>
    %86 = vector.shape_cast %80 : vector<4x8xf32> to vector<1x4x1x8xf32>
    tpu.vector_store %arg7[%c0_63, %c4_64, %c2_65, %c0_66], %86 {strides = array<i32>} : memref<1x8x8x8xf32, #tpu.memory_space<vmem>>, vector<1x4x1x8xf32>,
    %cst_67 = arith.constant dense<0.000000e+00> : vector<4xf32>
    %87 = vector.multi_reduction <add>, %78, %cst_67 [1] : vector<4x8xf32> to vector<4xf32>
    %88 = vector.shape_cast %87 : vector<4xf32> to vector<4x1xf32>
    %89 = arith.addf %59, %88 : vector<4x1xf32>
    %cst_68 = arith.constant dense<0.000000e+00> : vector<4xf32>
    %90 = vector.multi_reduction <add>, %80, %cst_68 [1] : vector<4x8xf32> to vector<4xf32>
    %91 = vector.shape_cast %90 : vector<4xf32> to vector<4x1xf32>
    %92 = arith.addf %62, %91 : vector<4x1xf32>
    %93 = arith.mulf %78, %78 : vector<4x8xf32>
    %cst_69 = arith.constant dense<0.000000e+00> : vector<4xf32>
    %94 = vector.multi_reduction <add>, %93, %cst_69 [1] : vector<4x8xf32> to vector<4xf32>
    %95 = vector.shape_cast %94 : vector<4xf32> to vector<4x1xf32>
    %96 = arith.addf %66, %95 : vector<4x1xf32>
    %97 = arith.mulf %80, %80 : vector<4x8xf32>
    %cst_70 = arith.constant dense<0.000000e+00> : vector<4xf32>
    %98 = vector.multi_reduction <add>, %97, %cst_70 [1] : vector<4x8xf32> to vector<4xf32>
    %99 = vector.shape_cast %98 : vector<4xf32> to vector<4x1xf32>
    %100 = arith.addf %70, %99 : vector<4x1xf32>
    %c0_71 = arith.constant 0 : index
    %c0_72 = arith.constant 0 : index
    %c3 = arith.constant 3 : index
    %c0_73 = arith.constant 0 : index
    %101 = vector.load %arg2[%c0_71, %c0_72, %c3, %c0_73] : memref<1x4x8x32xf32, #tpu.memory_space<vmem>>, vector<1x4x1x32xf32>
    %102 = vector.shape_cast %101 : vector<1x4x1x32xf32> to vector<4x32xf32>
    %cst_74 = arith.constant 0.000000e+00 : f32
    %103 = vector.broadcast %cst_74 : f32 to vector<4x32xf32>
    %104 = arith.maximumf %102, %103 : vector<4x32xf32>
    %105 = vector.extract_strided_slice %104 {offsets = [0, 0], sizes = [4, 16], strides = [1, 1]} : vector<4x32xf32> to vector<4x16xf32>
    %106 = vector.extract_strided_slice %104 {offsets = [0, 16], sizes = [4, 16], strides = [1, 1]} : vector<4x32xf32> to vector<4x16xf32>
    %cst_75 = arith.constant dense<0.000000e+00> : vector<4x8xf32>
    %107 = tpu.matmul %105, %5, %cst_75 {dimension_numbers = #tpu.dot_dimension_numbers<[1], [0], [0], [1], [0, 0, 1, 1], [], []>} : vector<4x16xf32>, vector<16x8xf32>, vector<4x8xf32> -> vector<4x8xf32>
    %cst_76 = arith.constant dense<0.000000e+00> : vector<4x8xf32>
    %108 = tpu.matmul %3, %107, %cst_76 {dimension_numbers = #tpu.dot_dimension_numbers<[1], [0], [0], [1], [0, 0, 1, 1], [], []>} : vector<4x4xf32>, vector<4x8xf32>, vector<4x8xf32> -> vector<4x8xf32>
    %cst_77 = arith.constant dense<0.000000e+00> : vector<4x8xf32>
    %109 = tpu.matmul %106, %6, %cst_77 {dimension_numbers = #tpu.dot_dimension_numbers<[1], [0], [0], [1], [0, 0, 1, 1], [], []>} : vector<4x16xf32>, vector<16x8xf32>, vector<4x8xf32> -> vector<4x8xf32>
    %cst_78 = arith.constant dense<0.000000e+00> : vector<4x8xf32>
    %110 = tpu.matmul %4, %109, %cst_78 {dimension_numbers = #tpu.dot_dimension_numbers<[1], [0], [0], [1], [0, 0, 1, 1], [], []>} : vector<4x4xf32>, vector<4x8xf32>, vector<4x8xf32> -> vector<4x8xf32>
    %c0_79 = arith.constant 0 : index
    %c0_80 = arith.constant 0 : index
    %c3_81 = arith.constant 3 : index
    %c0_82 = arith.constant 0 : index
    %111 = vector.load %arg7[%c0_79, %c0_80, %c3_81, %c0_82] : memref<1x8x8x8xf32, #tpu.memory_space<vmem>>, vector<1x4x1x8xf32>
    %112 = vector.shape_cast %111 : vector<1x4x1x8xf32> to vector<4x8xf32>
    %113 = vector.shape_cast %108 : vector<4x8xf32> to vector<1x4x1x8xf32>
    tpu.vector_store %arg7[%c0_79, %c0_80, %c3_81, %c0_82], %113 {strides = array<i32>} : memref<1x8x8x8xf32, #tpu.memory_space<vmem>>, vector<1x4x1x8xf32>,
    %c0_83 = arith.constant 0 : index
    %c4_84 = arith.constant 4 : index
    %c3_85 = arith.constant 3 : index
    %c0_86 = arith.constant 0 : index
    %114 = vector.load %arg7[%c0_83, %c4_84, %c3_85, %c0_86] : memref<1x8x8x8xf32, #tpu.memory_space<vmem>>, vector<1x4x1x8xf32>
    %115 = vector.shape_cast %114 : vector<1x4x1x8xf32> to vector<4x8xf32>
    %116 = vector.shape_cast %110 : vector<4x8xf32> to vector<1x4x1x8xf32>
    tpu.vector_store %arg7[%c0_83, %c4_84, %c3_85, %c0_86], %116 {strides = array<i32>} : memref<1x8x8x8xf32, #tpu.memory_space<vmem>>, vector<1x4x1x8xf32>,
    %cst_87 = arith.constant dense<0.000000e+00> : vector<4xf32>
    %117 = vector.multi_reduction <add>, %108, %cst_87 [1] : vector<4x8xf32> to vector<4xf32>
    %118 = vector.shape_cast %117 : vector<4xf32> to vector<4x1xf32>
    %119 = arith.addf %89, %118 : vector<4x1xf32>
    %cst_88 = arith.constant dense<0.000000e+00> : vector<4xf32>
    %120 = vector.multi_reduction <add>, %110, %cst_88 [1] : vector<4x8xf32> to vector<4xf32>
    %121 = vector.shape_cast %120 : vector<4xf32> to vector<4x1xf32>
    %122 = arith.addf %92, %121 : vector<4x1xf32>
    %123 = arith.mulf %108, %108 : vector<4x8xf32>
    %cst_89 = arith.constant dense<0.000000e+00> : vector<4xf32>
    %124 = vector.multi_reduction <add>, %123, %cst_89 [1] : vector<4x8xf32> to vector<4xf32>
    %125 = vector.shape_cast %124 : vector<4xf32> to vector<4x1xf32>
    %126 = arith.addf %96, %125 : vector<4x1xf32>
    %127 = arith.mulf %110, %110 : vector<4x8xf32>
    %cst_90 = arith.constant dense<0.000000e+00> : vector<4xf32>
    %128 = vector.multi_reduction <add>, %127, %cst_90 [1] : vector<4x8xf32> to vector<4xf32>
    %129 = vector.shape_cast %128 : vector<4xf32> to vector<4x1xf32>
    %130 = arith.addf %100, %129 : vector<4x1xf32>
    %c0_91 = arith.constant 0 : index
    %c0_92 = arith.constant 0 : index
    %c4_93 = arith.constant 4 : index
    %c0_94 = arith.constant 0 : index
    %131 = vector.load %arg2[%c0_91, %c0_92, %c4_93, %c0_94] : memref<1x4x8x32xf32, #tpu.memory_space<vmem>>, vector<1x4x1x32xf32>
    %132 = vector.shape_cast %131 : vector<1x4x1x32xf32> to vector<4x32xf32>
    %cst_95 = arith.constant 0.000000e+00 : f32
    %133 = vector.broadcast %cst_95 : f32 to vector<4x32xf32>
    %134 = arith.maximumf %132, %133 : vector<4x32xf32>
    %135 = vector.extract_strided_slice %134 {offsets = [0, 0], sizes = [4, 16], strides = [1, 1]} : vector<4x32xf32> to vector<4x16xf32>
    %136 = vector.extract_strided_slice %134 {offsets = [0, 16], sizes = [4, 16], strides = [1, 1]} : vector<4x32xf32> to vector<4x16xf32>
    %cst_96 = arith.constant dense<0.000000e+00> : vector<4x8xf32>
    %137 = tpu.matmul %135, %5, %cst_96 {dimension_numbers = #tpu.dot_dimension_numbers<[1], [0], [0], [1], [0, 0, 1, 1], [], []>} : vector<4x16xf32>, vector<16x8xf32>, vector<4x8xf32> -> vector<4x8xf32>
    %cst_97 = arith.constant dense<0.000000e+00> : vector<4x8xf32>
    %138 = tpu.matmul %3, %137, %cst_97 {dimension_numbers = #tpu.dot_dimension_numbers<[1], [0], [0], [1], [0, 0, 1, 1], [], []>} : vector<4x4xf32>, vector<4x8xf32>, vector<4x8xf32> -> vector<4x8xf32>
    %cst_98 = arith.constant dense<0.000000e+00> : vector<4x8xf32>
    %139 = tpu.matmul %136, %6, %cst_98 {dimension_numbers = #tpu.dot_dimension_numbers<[1], [0], [0], [1], [0, 0, 1, 1], [], []>} : vector<4x16xf32>, vector<16x8xf32>, vector<4x8xf32> -> vector<4x8xf32>
    %cst_99 = arith.constant dense<0.000000e+00> : vector<4x8xf32>
    %140 = tpu.matmul %4, %139, %cst_99 {dimension_numbers = #tpu.dot_dimension_numbers<[1], [0], [0], [1], [0, 0, 1, 1], [], []>} : vector<4x4xf32>, vector<4x8xf32>, vector<4x8xf32> -> vector<4x8xf32>
    %c0_100 = arith.constant 0 : index
    %c0_101 = arith.constant 0 : index
    %c4_102 = arith.constant 4 : index
    %c0_103 = arith.constant 0 : index
    %141 = vector.load %arg7[%c0_100, %c0_101, %c4_102, %c0_103] : memref<1x8x8x8xf32, #tpu.memory_space<vmem>>, vector<1x4x1x8xf32>
    %142 = vector.shape_cast %141 : vector<1x4x1x8xf32> to vector<4x8xf32>
    %143 = vector.shape_cast %138 : vector<4x8xf32> to vector<1x4x1x8xf32>
    tpu.vector_store %arg7[%c0_100, %c0_101, %c4_102, %c0_103], %143 {strides = array<i32>} : memref<1x8x8x8xf32, #tpu.memory_space<vmem>>, vector<1x4x1x8xf32>,
    %c0_104 = arith.constant 0 : index
    %c4_105 = arith.constant 4 : index
    %c4_106 = arith.constant 4 : index
    %c0_107 = arith.constant 0 : index
    %144 = vector.load %arg7[%c0_104, %c4_105, %c4_106, %c0_107] : memref<1x8x8x8xf32, #tpu.memory_space<vmem>>, vector<1x4x1x8xf32>
    %145 = vector.shape_cast %144 : vector<1x4x1x8xf32> to vector<4x8xf32>
    %146 = vector.shape_cast %140 : vector<4x8xf32> to vector<1x4x1x8xf32>
    tpu.vector_store %arg7[%c0_104, %c4_105, %c4_106, %c0_107], %146 {strides = array<i32>} : memref<1x8x8x8xf32, #tpu.memory_space<vmem>>, vector<1x4x1x8xf32>,
    %cst_108 = arith.constant dense<0.000000e+00> : vector<4xf32>
    %147 = vector.multi_reduction <add>, %138, %cst_108 [1] : vector<4x8xf32> to vector<4xf32>
    %148 = vector.shape_cast %147 : vector<4xf32> to vector<4x1xf32>
    %149 = arith.addf %119, %148 : vector<4x1xf32>
    %cst_109 = arith.constant dense<0.000000e+00> : vector<4xf32>
    %150 = vector.multi_reduction <add>, %140, %cst_109 [1] : vector<4x8xf32> to vector<4xf32>
    %151 = vector.shape_cast %150 : vector<4xf32> to vector<4x1xf32>
    %152 = arith.addf %122, %151 : vector<4x1xf32>
    %153 = arith.mulf %138, %138 : vector<4x8xf32>
    %cst_110 = arith.constant dense<0.000000e+00> : vector<4xf32>
    %154 = vector.multi_reduction <add>, %153, %cst_110 [1] : vector<4x8xf32> to vector<4xf32>
    %155 = vector.shape_cast %154 : vector<4xf32> to vector<4x1xf32>
    %156 = arith.addf %126, %155 : vector<4x1xf32>
    %157 = arith.mulf %140, %140 : vector<4x8xf32>
    %cst_111 = arith.constant dense<0.000000e+00> : vector<4xf32>
    %158 = vector.multi_reduction <add>, %157, %cst_111 [1] : vector<4x8xf32> to vector<4xf32>
    %159 = vector.shape_cast %158 : vector<4xf32> to vector<4x1xf32>
    %160 = arith.addf %130, %159 : vector<4x1xf32>
    %c0_112 = arith.constant 0 : index
    %c0_113 = arith.constant 0 : index
    %c5 = arith.constant 5 : index
    %c0_114 = arith.constant 0 : index
    %161 = vector.load %arg2[%c0_112, %c0_113, %c5, %c0_114] : memref<1x4x8x32xf32, #tpu.memory_space<vmem>>, vector<1x4x1x32xf32>
    %162 = vector.shape_cast %161 : vector<1x4x1x32xf32> to vector<4x32xf32>
    %cst_115 = arith.constant 0.000000e+00 : f32
    %163 = vector.broadcast %cst_115 : f32 to vector<4x32xf32>
    %164 = arith.maximumf %162, %163 : vector<4x32xf32>
    %165 = vector.extract_strided_slice %164 {offsets = [0, 0], sizes = [4, 16], strides = [1, 1]} : vector<4x32xf32> to vector<4x16xf32>
    %166 = vector.extract_strided_slice %164 {offsets = [0, 16], sizes = [4, 16], strides = [1, 1]} : vector<4x32xf32> to vector<4x16xf32>
    %cst_116 = arith.constant dense<0.000000e+00> : vector<4x8xf32>
    %167 = tpu.matmul %165, %5, %cst_116 {dimension_numbers = #tpu.dot_dimension_numbers<[1], [0], [0], [1], [0, 0, 1, 1], [], []>} : vector<4x16xf32>, vector<16x8xf32>, vector<4x8xf32> -> vector<4x8xf32>
    %cst_117 = arith.constant dense<0.000000e+00> : vector<4x8xf32>
    %168 = tpu.matmul %3, %167, %cst_117 {dimension_numbers = #tpu.dot_dimension_numbers<[1], [0], [0], [1], [0, 0, 1, 1], [], []>} : vector<4x4xf32>, vector<4x8xf32>, vector<4x8xf32> -> vector<4x8xf32>
    %cst_118 = arith.constant dense<0.000000e+00> : vector<4x8xf32>
    %169 = tpu.matmul %166, %6, %cst_118 {dimension_numbers = #tpu.dot_dimension_numbers<[1], [0], [0], [1], [0, 0, 1, 1], [], []>} : vector<4x16xf32>, vector<16x8xf32>, vector<4x8xf32> -> vector<4x8xf32>
    %cst_119 = arith.constant dense<0.000000e+00> : vector<4x8xf32>
    %170 = tpu.matmul %4, %169, %cst_119 {dimension_numbers = #tpu.dot_dimension_numbers<[1], [0], [0], [1], [0, 0, 1, 1], [], []>} : vector<4x4xf32>, vector<4x8xf32>, vector<4x8xf32> -> vector<4x8xf32>
    %c0_120 = arith.constant 0 : index
    %c0_121 = arith.constant 0 : index
    %c5_122 = arith.constant 5 : index
    %c0_123 = arith.constant 0 : index
    %171 = vector.load %arg7[%c0_120, %c0_121, %c5_122, %c0_123] : memref<1x8x8x8xf32, #tpu.memory_space<vmem>>, vector<1x4x1x8xf32>
    %172 = vector.shape_cast %171 : vector<1x4x1x8xf32> to vector<4x8xf32>
    %173 = vector.shape_cast %168 : vector<4x8xf32> to vector<1x4x1x8xf32>
    tpu.vector_store %arg7[%c0_120, %c0_121, %c5_122, %c0_123], %173 {strides = array<i32>} : memref<1x8x8x8xf32, #tpu.memory_space<vmem>>, vector<1x4x1x8xf32>,
    %c0_124 = arith.constant 0 : index
    %c4_125 = arith.constant 4 : index
    %c5_126 = arith.constant 5 : index
    %c0_127 = arith.constant 0 : index
    %174 = vector.load %arg7[%c0_124, %c4_125, %c5_126, %c0_127] : memref<1x8x8x8xf32, #tpu.memory_space<vmem>>, vector<1x4x1x8xf32>
    %175 = vector.shape_cast %174 : vector<1x4x1x8xf32> to vector<4x8xf32>
    %176 = vector.shape_cast %170 : vector<4x8xf32> to vector<1x4x1x8xf32>
    tpu.vector_store %arg7[%c0_124, %c4_125, %c5_126, %c0_127], %176 {strides = array<i32>} : memref<1x8x8x8xf32, #tpu.memory_space<vmem>>, vector<1x4x1x8xf32>,
    %cst_128 = arith.constant dense<0.000000e+00> : vector<4xf32>
    %177 = vector.multi_reduction <add>, %168, %cst_128 [1] : vector<4x8xf32> to vector<4xf32>
    %178 = vector.shape_cast %177 : vector<4xf32> to vector<4x1xf32>
    %179 = arith.addf %149, %178 : vector<4x1xf32>
    %cst_129 = arith.constant dense<0.000000e+00> : vector<4xf32>
    %180 = vector.multi_reduction <add>, %170, %cst_129 [1] : vector<4x8xf32> to vector<4xf32>
    %181 = vector.shape_cast %180 : vector<4xf32> to vector<4x1xf32>
    %182 = arith.addf %152, %181 : vector<4x1xf32>
    %183 = arith.mulf %168, %168 : vector<4x8xf32>
    %cst_130 = arith.constant dense<0.000000e+00> : vector<4xf32>
    %184 = vector.multi_reduction <add>, %183, %cst_130 [1] : vector<4x8xf32> to vector<4xf32>
    %185 = vector.shape_cast %184 : vector<4xf32> to vector<4x1xf32>
    %186 = arith.addf %156, %185 : vector<4x1xf32>
    %187 = arith.mulf %170, %170 : vector<4x8xf32>
    %cst_131 = arith.constant dense<0.000000e+00> : vector<4xf32>
    %188 = vector.multi_reduction <add>, %187, %cst_131 [1] : vector<4x8xf32> to vector<4xf32>
    %189 = vector.shape_cast %188 : vector<4xf32> to vector<4x1xf32>
    %190 = arith.addf %160, %189 : vector<4x1xf32>
    %c0_132 = arith.constant 0 : index
    %c0_133 = arith.constant 0 : index
    %c6 = arith.constant 6 : index
    %c0_134 = arith.constant 0 : index
    %191 = vector.load %arg2[%c0_132, %c0_133, %c6, %c0_134] : memref<1x4x8x32xf32, #tpu.memory_space<vmem>>, vector<1x4x1x32xf32>
    %192 = vector.shape_cast %191 : vector<1x4x1x32xf32> to vector<4x32xf32>
    %cst_135 = arith.constant 0.000000e+00 : f32
    %193 = vector.broadcast %cst_135 : f32 to vector<4x32xf32>
    %194 = arith.maximumf %192, %193 : vector<4x32xf32>
    %195 = vector.extract_strided_slice %194 {offsets = [0, 0], sizes = [4, 16], strides = [1, 1]} : vector<4x32xf32> to vector<4x16xf32>
    %196 = vector.extract_strided_slice %194 {offsets = [0, 16], sizes = [4, 16], strides = [1, 1]} : vector<4x32xf32> to vector<4x16xf32>
    %cst_136 = arith.constant dense<0.000000e+00> : vector<4x8xf32>
    %197 = tpu.matmul %195, %5, %cst_136 {dimension_numbers = #tpu.dot_dimension_numbers<[1], [0], [0], [1], [0, 0, 1, 1], [], []>} : vector<4x16xf32>, vector<16x8xf32>, vector<4x8xf32> -> vector<4x8xf32>
    %cst_137 = arith.constant dense<0.000000e+00> : vector<4x8xf32>
    %198 = tpu.matmul %3, %197, %cst_137 {dimension_numbers = #tpu.dot_dimension_numbers<[1], [0], [0], [1], [0, 0, 1, 1], [], []>} : vector<4x4xf32>, vector<4x8xf32>, vector<4x8xf32> -> vector<4x8xf32>
    %cst_138 = arith.constant dense<0.000000e+00> : vector<4x8xf32>
    %199 = tpu.matmul %196, %6, %cst_138 {dimension_numbers = #tpu.dot_dimension_numbers<[1], [0], [0], [1], [0, 0, 1, 1], [], []>} : vector<4x16xf32>, vector<16x8xf32>, vector<4x8xf32> -> vector<4x8xf32>
    %cst_139 = arith.constant dense<0.000000e+00> : vector<4x8xf32>
    %200 = tpu.matmul %4, %199, %cst_139 {dimension_numbers = #tpu.dot_dimension_numbers<[1], [0], [0], [1], [0, 0, 1, 1], [], []>} : vector<4x4xf32>, vector<4x8xf32>, vector<4x8xf32> -> vector<4x8xf32>
    %c0_140 = arith.constant 0 : index
    %c0_141 = arith.constant 0 : index
    %c6_142 = arith.constant 6 : index
    %c0_143 = arith.constant 0 : index
    %201 = vector.load %arg7[%c0_140, %c0_141, %c6_142, %c0_143] : memref<1x8x8x8xf32, #tpu.memory_space<vmem>>, vector<1x4x1x8xf32>
    %202 = vector.shape_cast %201 : vector<1x4x1x8xf32> to vector<4x8xf32>
    %203 = vector.shape_cast %198 : vector<4x8xf32> to vector<1x4x1x8xf32>
    tpu.vector_store %arg7[%c0_140, %c0_141, %c6_142, %c0_143], %203 {strides = array<i32>} : memref<1x8x8x8xf32, #tpu.memory_space<vmem>>, vector<1x4x1x8xf32>,
    %c0_144 = arith.constant 0 : index
    %c4_145 = arith.constant 4 : index
    %c6_146 = arith.constant 6 : index
    %c0_147 = arith.constant 0 : index
    %204 = vector.load %arg7[%c0_144, %c4_145, %c6_146, %c0_147] : memref<1x8x8x8xf32, #tpu.memory_space<vmem>>, vector<1x4x1x8xf32>
    %205 = vector.shape_cast %204 : vector<1x4x1x8xf32> to vector<4x8xf32>
    %206 = vector.shape_cast %200 : vector<4x8xf32> to vector<1x4x1x8xf32>
    tpu.vector_store %arg7[%c0_144, %c4_145, %c6_146, %c0_147], %206 {strides = array<i32>} : memref<1x8x8x8xf32, #tpu.memory_space<vmem>>, vector<1x4x1x8xf32>,
    %cst_148 = arith.constant dense<0.000000e+00> : vector<4xf32>
    %207 = vector.multi_reduction <add>, %198, %cst_148 [1] : vector<4x8xf32> to vector<4xf32>
    %208 = vector.shape_cast %207 : vector<4xf32> to vector<4x1xf32>
    %209 = arith.addf %179, %208 : vector<4x1xf32>
    %cst_149 = arith.constant dense<0.000000e+00> : vector<4xf32>
    %210 = vector.multi_reduction <add>, %200, %cst_149 [1] : vector<4x8xf32> to vector<4xf32>
    %211 = vector.shape_cast %210 : vector<4xf32> to vector<4x1xf32>
    %212 = arith.addf %182, %211 : vector<4x1xf32>
    %213 = arith.mulf %198, %198 : vector<4x8xf32>
    %cst_150 = arith.constant dense<0.000000e+00> : vector<4xf32>
    %214 = vector.multi_reduction <add>, %213, %cst_150 [1] : vector<4x8xf32> to vector<4xf32>
    %215 = vector.shape_cast %214 : vector<4xf32> to vector<4x1xf32>
    %216 = arith.addf %186, %215 : vector<4x1xf32>
    %217 = arith.mulf %200, %200 : vector<4x8xf32>
    %cst_151 = arith.constant dense<0.000000e+00> : vector<4xf32>
    %218 = vector.multi_reduction <add>, %217, %cst_151 [1] : vector<4x8xf32> to vector<4xf32>
    %219 = vector.shape_cast %218 : vector<4xf32> to vector<4x1xf32>
    %220 = arith.addf %190, %219 : vector<4x1xf32>
    %c0_152 = arith.constant 0 : index
    %c0_153 = arith.constant 0 : index
    %c7 = arith.constant 7 : index
    %c0_154 = arith.constant 0 : index
    %221 = vector.load %arg2[%c0_152, %c0_153, %c7, %c0_154] : memref<1x4x8x32xf32, #tpu.memory_space<vmem>>, vector<1x4x1x32xf32>
    %222 = vector.shape_cast %221 : vector<1x4x1x32xf32> to vector<4x32xf32>
    %cst_155 = arith.constant 0.000000e+00 : f32
    %223 = vector.broadcast %cst_155 : f32 to vector<4x32xf32>
    %224 = arith.maximumf %222, %223 : vector<4x32xf32>
    %225 = vector.extract_strided_slice %224 {offsets = [0, 0], sizes = [4, 16], strides = [1, 1]} : vector<4x32xf32> to vector<4x16xf32>
    %226 = vector.extract_strided_slice %224 {offsets = [0, 16], sizes = [4, 16], strides = [1, 1]} : vector<4x32xf32> to vector<4x16xf32>
    %cst_156 = arith.constant dense<0.000000e+00> : vector<4x8xf32>
    %227 = tpu.matmul %225, %5, %cst_156 {dimension_numbers = #tpu.dot_dimension_numbers<[1], [0], [0], [1], [0, 0, 1, 1], [], []>} : vector<4x16xf32>, vector<16x8xf32>, vector<4x8xf32> -> vector<4x8xf32>
    %cst_157 = arith.constant dense<0.000000e+00> : vector<4x8xf32>
    %228 = tpu.matmul %3, %227, %cst_157 {dimension_numbers = #tpu.dot_dimension_numbers<[1], [0], [0], [1], [0, 0, 1, 1], [], []>} : vector<4x4xf32>, vector<4x8xf32>, vector<4x8xf32> -> vector<4x8xf32>
    %cst_158 = arith.constant dense<0.000000e+00> : vector<4x8xf32>
    %229 = tpu.matmul %226, %6, %cst_158 {dimension_numbers = #tpu.dot_dimension_numbers<[1], [0], [0], [1], [0, 0, 1, 1], [], []>} : vector<4x16xf32>, vector<16x8xf32>, vector<4x8xf32> -> vector<4x8xf32>
    %cst_159 = arith.constant dense<0.000000e+00> : vector<4x8xf32>
    %230 = tpu.matmul %4, %229, %cst_159 {dimension_numbers = #tpu.dot_dimension_numbers<[1], [0], [0], [1], [0, 0, 1, 1], [], []>} : vector<4x4xf32>, vector<4x8xf32>, vector<4x8xf32> -> vector<4x8xf32>
    %c0_160 = arith.constant 0 : index
    %c0_161 = arith.constant 0 : index
    %c7_162 = arith.constant 7 : index
    %c0_163 = arith.constant 0 : index
    %231 = vector.load %arg7[%c0_160, %c0_161, %c7_162, %c0_163] : memref<1x8x8x8xf32, #tpu.memory_space<vmem>>, vector<1x4x1x8xf32>
    %232 = vector.shape_cast %231 : vector<1x4x1x8xf32> to vector<4x8xf32>
    %233 = vector.shape_cast %228 : vector<4x8xf32> to vector<1x4x1x8xf32>
    tpu.vector_store %arg7[%c0_160, %c0_161, %c7_162, %c0_163], %233 {strides = array<i32>} : memref<1x8x8x8xf32, #tpu.memory_space<vmem>>, vector<1x4x1x8xf32>,
    %c0_164 = arith.constant 0 : index
    %c4_165 = arith.constant 4 : index
    %c7_166 = arith.constant 7 : index
    %c0_167 = arith.constant 0 : index
    %234 = vector.load %arg7[%c0_164, %c4_165, %c7_166, %c0_167] : memref<1x8x8x8xf32, #tpu.memory_space<vmem>>, vector<1x4x1x8xf32>
    %235 = vector.shape_cast %234 : vector<1x4x1x8xf32> to vector<4x8xf32>
    %236 = vector.shape_cast %230 : vector<4x8xf32> to vector<1x4x1x8xf32>
    tpu.vector_store %arg7[%c0_164, %c4_165, %c7_166, %c0_167], %236 {strides = array<i32>} : memref<1x8x8x8xf32, #tpu.memory_space<vmem>>, vector<1x4x1x8xf32>,
    %cst_168 = arith.constant dense<0.000000e+00> : vector<4xf32>
    %237 = vector.multi_reduction <add>, %228, %cst_168 [1] : vector<4x8xf32> to vector<4xf32>
    %238 = vector.shape_cast %237 : vector<4xf32> to vector<4x1xf32>
    %239 = arith.addf %209, %238 : vector<4x1xf32>
    %cst_169 = arith.constant dense<0.000000e+00> : vector<4xf32>
    %240 = vector.multi_reduction <add>, %230, %cst_169 [1] : vector<4x8xf32> to vector<4xf32>
    %241 = vector.shape_cast %240 : vector<4xf32> to vector<4x1xf32>
    %242 = arith.addf %212, %241 : vector<4x1xf32>
    %243 = arith.mulf %228, %228 : vector<4x8xf32>
    %cst_170 = arith.constant dense<0.000000e+00> : vector<4xf32>
    %244 = vector.multi_reduction <add>, %243, %cst_170 [1] : vector<4x8xf32> to vector<4xf32>
    %245 = vector.shape_cast %244 : vector<4xf32> to vector<4x1xf32>
    %246 = arith.addf %216, %245 : vector<4x1xf32>
    %247 = arith.mulf %230, %230 : vector<4x8xf32>
    %cst_171 = arith.constant dense<0.000000e+00> : vector<4xf32>
    %248 = vector.multi_reduction <add>, %247, %cst_171 [1] : vector<4x8xf32> to vector<4xf32>
    %249 = vector.shape_cast %248 : vector<4xf32> to vector<4x1xf32>
    %250 = arith.addf %220, %249 : vector<4x1xf32>
    %c0_172 = arith.constant 0 : index
    %c0_173 = arith.constant 0 : index
    %c0_174 = arith.constant 0 : index
    %251 = vector.load %arg8[%c0_172, %c0_173, %c0_174] : memref<1x8x1xf32, #tpu.memory_space<vmem>>, vector<1x4x1xf32>
    %252 = vector.shape_cast %251 : vector<1x4x1xf32> to vector<4x1xf32>
    %253 = arith.addf %252, %239 : vector<4x1xf32>
    %c0_175 = arith.constant 0 : index
    %c0_176 = arith.constant 0 : index
    %c0_177 = arith.constant 0 : index
    %254 = vector.load %arg8[%c0_175, %c0_176, %c0_177] : memref<1x8x1xf32, #tpu.memory_space<vmem>>, vector<1x4x1xf32>
    %255 = vector.shape_cast %254 : vector<1x4x1xf32> to vector<4x1xf32>
    %256 = vector.shape_cast %253 : vector<4x1xf32> to vector<1x4x1xf32>
    tpu.vector_store %arg8[%c0_175, %c0_176, %c0_177], %256 {strides = array<i32>} : memref<1x8x1xf32, #tpu.memory_space<vmem>>, vector<1x4x1xf32>,
    %c0_178 = arith.constant 0 : index
    %c4_179 = arith.constant 4 : index
    %c0_180 = arith.constant 0 : index
    %257 = vector.load %arg8[%c0_178, %c4_179, %c0_180] : memref<1x8x1xf32, #tpu.memory_space<vmem>>, vector<1x4x1xf32>
    %258 = vector.shape_cast %257 : vector<1x4x1xf32> to vector<4x1xf32>
    %259 = arith.addf %258, %242 : vector<4x1xf32>
    %c0_181 = arith.constant 0 : index
    %c4_182 = arith.constant 4 : index
    %c0_183 = arith.constant 0 : index
    %260 = vector.load %arg8[%c0_181, %c4_182, %c0_183] : memref<1x8x1xf32, #tpu.memory_space<vmem>>, vector<1x4x1xf32>
    %261 = vector.shape_cast %260 : vector<1x4x1xf32> to vector<4x1xf32>
    %262 = vector.shape_cast %259 : vector<4x1xf32> to vector<1x4x1xf32>
    tpu.vector_store %arg8[%c0_181, %c4_182, %c0_183], %262 {strides = array<i32>} : memref<1x8x1xf32, #tpu.memory_space<vmem>>, vector<1x4x1xf32>,
    %c0_184 = arith.constant 0 : index
    %c0_185 = arith.constant 0 : index
    %c0_186 = arith.constant 0 : index
    %263 = vector.load %arg9[%c0_184, %c0_185, %c0_186] : memref<1x8x1xf32, #tpu.memory_space<vmem>>, vector<1x4x1xf32>
    %264 = vector.shape_cast %263 : vector<1x4x1xf32> to vector<4x1xf32>
    %265 = arith.addf %264, %246 : vector<4x1xf32>
    %c0_187 = arith.constant 0 : index
    %c0_188 = arith.constant 0 : index
    %c0_189 = arith.constant 0 : index
    %266 = vector.load %arg9[%c0_187, %c0_188, %c0_189] : memref<1x8x1xf32, #tpu.memory_space<vmem>>, vector<1x4x1xf32>
    %267 = vector.shape_cast %266 : vector<1x4x1xf32> to vector<4x1xf32>
    %268 = vector.shape_cast %265 : vector<4x1xf32> to vector<1x4x1xf32>
    tpu.vector_store %arg9[%c0_187, %c0_188, %c0_189], %268 {strides = array<i32>} : memref<1x8x1xf32, #tpu.memory_space<vmem>>, vector<1x4x1xf32>,
    %c0_190 = arith.constant 0 : index
    %c4_191 = arith.constant 4 : index
    %c0_192 = arith.constant 0 : index
    %269 = vector.load %arg9[%c0_190, %c4_191, %c0_192] : memref<1x8x1xf32, #tpu.memory_space<vmem>>, vector<1x4x1xf32>
    %270 = vector.shape_cast %269 : vector<1x4x1xf32> to vector<4x1xf32>
    %271 = arith.addf %270, %250 : vector<4x1xf32>
    %c0_193 = arith.constant 0 : index
    %c4_194 = arith.constant 4 : index
    %c0_195 = arith.constant 0 : index
    %272 = vector.load %arg9[%c0_193, %c4_194, %c0_195] : memref<1x8x1xf32, #tpu.memory_space<vmem>>, vector<1x4x1xf32>
    %273 = vector.shape_cast %272 : vector<1x4x1xf32> to vector<4x1xf32>
    %274 = vector.shape_cast %271 : vector<4x1xf32> to vector<1x4x1xf32>
    tpu.vector_store %arg9[%c0_193, %c4_194, %c0_195], %274 {strides = array<i32>} : memref<1x8x1xf32, #tpu.memory_space<vmem>>, vector<1x4x1xf32>,
    return
  }
  func.func @transform_0(%arg0: i32, %arg1: i32) -> (i32, i32, i32, i32) {
    %c0_i32 = arith.constant 0 : i32
    %c0_i32_0 = arith.constant 0 : i32
    %c0_i32_1 = arith.constant 0 : i32
    return %arg0, %c0_i32, %arg1, %c0_i32_0 : i32, i32, i32, i32
  }
  func.func @transform_1(%arg0: i32, %arg1: i32) -> (i32, i32) {
    %c0_i32 = arith.constant 0 : i32
    %c0_i32_0 = arith.constant 0 : i32
    %c0_i32_1 = arith.constant 0 : i32
    return %c0_i32, %c0_i32_0 : i32, i32
  }
  func.func @transform_2(%arg0: i32, %arg1: i32) -> (i32, i32) {
    %c0_i32 = arith.constant 0 : i32
    %c0_i32_0 = arith.constant 0 : i32
    %c0_i32_1 = arith.constant 0 : i32
    return %c0_i32, %c0_i32_0 : i32, i32
  }
  func.func @transform_3(%arg0: i32, %arg1: i32) -> (i32, i32) {
    %c0_i32 = arith.constant 0 : i32
    %c0_i32_0 = arith.constant 0 : i32
    %c0_i32_1 = arith.constant 0 : i32
    return %c0_i32, %c0_i32_0 : i32, i32
  }
  func.func @transform_4(%arg0: i32, %arg1: i32) -> (i32, i32) {
    %c0_i32 = arith.constant 0 : i32
    %c0_i32_0 = arith.constant 0 : i32
    %c0_i32_1 = arith.constant 0 : i32
    return %c0_i32, %c0_i32_0 : i32, i32
  }
  func.func @transform_5(%arg0: i32, %arg1: i32) -> (i32, i32, i32, i32) {
    %c0_i32 = arith.constant 0 : i32
    %c0_i32_0 = arith.constant 0 : i32
    %c0_i32_1 = arith.constant 0 : i32
    return %arg0, %c0_i32, %arg1, %c0_i32_0 : i32, i32, i32, i32
  }
  func.func @transform_6(%arg0: i32, %arg1: i32) -> (i32, i32, i32) {
    %c0_i32 = arith.constant 0 : i32
    %c0_i32_0 = arith.constant 0 : i32
    %c0_i32_1 = arith.constant 0 : i32
    return %arg0, %c0_i32, %c0_i32_0 : i32, i32, i32
  }
  func.func @transform_7(%arg0: i32, %arg1: i32) -> (i32, i32, i32) {
    %c0_i32 = arith.constant 0 : i32
    %c0_i32_0 = arith.constant 0 : i32
    %c0_i32_1 = arith.constant 0 : i32
    return %arg0, %c0_i32, %c0_i32_0 : i32, i32, i32
  }
}

module attributes {stable_mosaic.version = 11 : i64} {
  func.func @_affine_kernel(%arg0: i32, %arg1: i32, %arg2: memref<1x8x64xf32, #tpu.memory_space<vmem>>, %arg3: memref<8x1xf32, #tpu.memory_space<vmem>>, %arg4: memref<8x1xf32, #tpu.memory_space<vmem>>, %arg5: memref<1x8x64xf32, #tpu.memory_space<vmem>>) attributes {dimension_semantics = [#tpu.dimension_semantics<parallel>, #tpu.dimension_semantics<parallel>], iteration_bounds = array<i64: 2, 1>, scalar_prefetch = 0 : i64, scratch_operands = 0 : i64, tpu.core_type = #tpu.core_type<tc>, window_params = [{transform_indices = @transform_0, window_bounds = array<i64: 1, 8, 64>}, {pipeline_mode = #tpu.pipeline_mode<synchronous>, transform_indices = @transform_1, window_bounds = array<i64: 8, 1>}, {pipeline_mode = #tpu.pipeline_mode<synchronous>, transform_indices = @transform_2, window_bounds = array<i64: 8, 1>}, {transform_indices = @transform_3, window_bounds = array<i64: 1, 8, 64>}]} {
    %c0 = arith.constant 0 : index
    %c0_0 = arith.constant 0 : index
    %c0_1 = arith.constant 0 : index
    %0 = vector.load %arg2[%c0, %c0_0, %c0_1] : memref<1x8x64xf32, #tpu.memory_space<vmem>>, vector<1x8x64xf32>
    %1 = vector.shape_cast %0 : vector<1x8x64xf32> to vector<8x64xf32>
    %c0_2 = arith.constant 0 : index
    %c0_3 = arith.constant 0 : index
    %2 = vector.load %arg3[%c0_2, %c0_3] : memref<8x1xf32, #tpu.memory_space<vmem>>, vector<8x1xf32>
    %3 = vector.broadcast %2 : vector<8x1xf32> to vector<8x64xf32>
    %4 = arith.mulf %1, %3 : vector<8x64xf32>
    %c0_4 = arith.constant 0 : index
    %c0_5 = arith.constant 0 : index
    %5 = vector.load %arg4[%c0_4, %c0_5] : memref<8x1xf32, #tpu.memory_space<vmem>>, vector<8x1xf32>
    %6 = vector.broadcast %5 : vector<8x1xf32> to vector<8x64xf32>
    %7 = arith.addf %4, %6 : vector<8x64xf32>
    %c0_6 = arith.constant 0 : index
    %c0_7 = arith.constant 0 : index
    %c0_8 = arith.constant 0 : index
    %8 = vector.load %arg5[%c0_6, %c0_7, %c0_8] : memref<1x8x64xf32, #tpu.memory_space<vmem>>, vector<1x8x64xf32>
    %9 = vector.shape_cast %8 : vector<1x8x64xf32> to vector<8x64xf32>
    %10 = vector.shape_cast %7 : vector<8x64xf32> to vector<1x8x64xf32>
    tpu.vector_store %arg5[%c0_6, %c0_7, %c0_8], %10 {strides = array<i32>} : memref<1x8x64xf32, #tpu.memory_space<vmem>>, vector<1x8x64xf32>,
    return
  }
  func.func @transform_0(%arg0: i32, %arg1: i32) -> (i32, i32, i32) {
    %c0_i32 = arith.constant 0 : i32
    %c0_i32_0 = arith.constant 0 : i32
    return %arg0, %c0_i32, %arg1 : i32, i32, i32
  }
  func.func @transform_1(%arg0: i32, %arg1: i32) -> (i32, i32) {
    %c0_i32 = arith.constant 0 : i32
    %c0_i32_0 = arith.constant 0 : i32
    %c0_i32_1 = arith.constant 0 : i32
    return %c0_i32, %c0_i32_0 : i32, i32
  }
  func.func @transform_2(%arg0: i32, %arg1: i32) -> (i32, i32) {
    %c0_i32 = arith.constant 0 : i32
    %c0_i32_0 = arith.constant 0 : i32
    %c0_i32_1 = arith.constant 0 : i32
    return %c0_i32, %c0_i32_0 : i32, i32
  }
  func.func @transform_3(%arg0: i32, %arg1: i32) -> (i32, i32, i32) {
    %c0_i32 = arith.constant 0 : i32
    %c0_i32_0 = arith.constant 0 : i32
    return %arg0, %c0_i32, %arg1 : i32, i32, i32
  }
}

</mosaic_0001>

<bundles_post_ra>
// kernel: factorized_reduce.3
= control target key start
LH: loop header
LB: loop body
LE: loop exit
PB: predicated region body
PF: predicated region fallthrough
CT: control target
= control target key end

     0   :  { %s368_s12 = smov 0   ;;  %s370_s13 = smov 0   ;;  %s404_s0 = inlined_call_operand.vmem [shape: f32[2,8,64], index: 0, kind: input, shape index: {}]   ;;  %s405_s1 = inlined_call_operand.vmem [shape: f32[8,1], index: 1, kind: input, shape index: {}]   ;;  %s406_s2 = inlined_call_operand.vmem [shape: f32[8,1], index: 2, kind: input, shape index: {}]   ;;  %s407_s3 = inlined_call_operand.vmem [shape: f32[2,8,64], index: 3, kind: output, shape index: {}]  }
   0x1   :  { %s372_s14 = smov 0  }
   0x2 LB: > { %s25_s15 = sadd.s32 1, %s341_s13  ;;  %p292_p0 = scmp.ge.s32.totalorder %s345_s14, 1  ;;  %s345_s14 = sphi %s372_s14, %s13_s14   ;;  %s341_s13 = sphi %s370_s13, %s409_s13   ;;  %s337_s12 = sphi %s368_s12, %s408_s12  }
   0x3   : > { %p27_p1 = scmp.ge.s32.totalorder %s25_s15, 2  ;;  %p155_p2 = scmp.lt.s32.totalorder %s345_s14, 3 }
   0x5   : > { %s411_s15 = smov (%p27_p1, %s25_s15), 0  ;;  %p156_p3 = pnand %p292_p0, %p155_p2 }
   0x6   : > { %p183_p4 = scmp.lt.s32.totalorder (!%p156_p3), %s337_s12, 1 }
   0x7   : > { %159 = sbr.rel (%p156_p3) target bundleno = 145 (0x91), region = 32 }
   0xc   : > { %v198_v0 = vld [vmem:[%s405_s1] sm:$0xff]  ;;  %v347_v1 = vmov 0   ;;  %s413_s12 = smov (!%p183_p4, %s337_s12), 1  ;;  %vm212_vm0 = vcmask 523264  }
   0xd   : > { %322 = vset.pattern.permute.xlu0 %v347_v1  ;;  %v205_v2 = vld [vmem:[%s406_s2] sm:$0xff]  ;;  %s293_s20 = sshll.u32 %s413_s12, 3 }
   0xe   : > { %201 = vperm.xlu0 %322, %v198_v0   ;;  %s189_s23 = scalar_lea.vmem %s404_s0, %s293_s20  ;;  %s196_s26 = scalar_lea.vmem %s407_s3, %s293_s20 }
   0xf   : > { %v197_v4 = vld [vmem:[%s189_s23] sm:$0xff] }
  0x12   : > { %208 = vperm.xlu0 %322, %v205_v2  }
  0x89   : > { %v202_v3 = vpop.permute.xlu0 %201 }
  0x8a   : > { %v204_v5 = vmul.f32 %v202_v3, %v197_v4 }
  0x8d   : > { %v209_v6 = vpop.permute.xlu0 %208 }
  0x8e   : > { %v211_v7 = vadd.f32 %v209_v6, %v204_v5 }
  0x90   : > { %213 = vst.msk [vmem:[%s196_s26] sm:$0xff] %vm212_vm0, %v211_v7 }
  0x91 PF: > { %s13_s14 = sadd.s32 1, %s345_s14   ;;  %s408_s12 = smov %s341_s13 }
  0x92   : > { %p10_p5 = scmp.ge.s32.totalorder %s13_s14, 4   ;;  %s409_s13 = smov %s411_s15 }
  0x94   :  { %12 = sbr.rel (!%p10_p5) target bundleno = 2 (0x2), region = 62 }

// kernel: factorized_reduce.2
= control target key start
LH: loop header
LB: loop body
LE: loop exit
PB: predicated region body
PF: predicated region fallthrough
CT: control target
= control target key end

     0   :  { %s4132_s24 = smov 0   ;;  %s4134_s25 = smov 0   ;;  %s4742_s0 = inlined_call_operand.vmem [shape: f32[2,4,8,32], index: 0, kind: input, shape index: {}]   ;;  %s4743_s1 = inlined_call_operand.vmem [shape: f32[4,4], index: 1, kind: input, shape index: {}]   ;;  %s4744_s2 = inlined_call_operand.vmem [shape: f32[4,4], index: 2, kind: input, shape index: {}]   ;;  %s4745_s3 = inlined_call_operand.vmem [shape: f32[16,8], index: 3, kind: input, shape index: {}]   ;;  %s4746_s4 = inlined_call_operand.vmem [shape: f32[16,8], index: 4, kind: input, shape index: {}]   ;;  %s4747_s5 = inlined_call_operand.vmem [shape: f32[2,8,8,8], index: 5, kind: output, shape index: {0}]   ;;  %s4748_s6 = inlined_call_operand.vmem [shape: f32[2,8,1], index: 6, kind: output, shape index: {1}]   ;;  %s4749_s7 = inlined_call_operand.vmem [shape: f32[2,8,1], index: 7, kind: output, shape index: {2}]  }
   0x1   :  { %s4136_s26 = smov 0  }
   0x2 LB: > { %s30_s27 = sadd.s32 1, %s4082_s25  ;;  %p3673_p0 = scmp.ge.s32.totalorder %s4086_s26, 1  ;;  %s4086_s26 = sphi %s4136_s26, %s18_s26   ;;  %s4082_s25 = sphi %s4134_s25, %s4751_s25   ;;  %s4078_s24 = sphi %s4132_s24, %s4750_s24  }
   0x3   : > { %p32_p1 = scmp.ge.s32.totalorder %s30_s27, 2  ;;  %p261_p2 = scmp.lt.s32.totalorder %s4086_s26, 3 }
   0x5   : > { %s4753_s27 = smov (%p32_p1, %s30_s27), 0  ;;  %p262_p3 = pnand %p3673_p0, %p261_p2 }
   0x6   : > { %p307_p4 = scmp.lt.s32.totalorder (!%p262_p3), %s4078_s24, 1  ;;  %s4090_s13 = smov (!%p262_p3), 112  }
   0x7   : > { %265 = sbr.rel (%p262_p3) target bundleno = 812 (0x32c), region = 40 }
   0xc   : > { %v4153_v0 = vld [vmem:[%s4745_s3 + $0x8] sm:$0xff]  ;;  %v4088_v1 = vmov 0.0   ;;  %v4159_v2 = vld [vmem:[%s4745_s3] sm:$0xff]  ;;  %vm4089_vm0 = vmmov 0   ;;  %s4755_s24 = smov (!%p307_p4, %s4078_s24), 1  ;;  %vm357_vm1 = vcmask 1041409  }
   0xd   : > { %3844 = vmatprep.subr.mxu0 %v4088_v1  ;;  %3848 = vmatprep.mubr.msk.f32.mxu0 %vm4089_vm0, %v4088_v1  ;;  %s3762_s9 = sshll.u32 %s4755_s24, 5  ;;  %vm360_vm2 = vcmask 1042434   ;;  %vm363_vm3 = vcmask 1043459   ;;  %vm365_vm4 = vcmask 130048   ;;  %vm442_vm5 = vcmask 1043456   ;;  %s3763_s20 = sshll.u32 %s4755_s24, 6 }
   0xe   : > { %3845 = vmatpush3.msra.mxu0 %v4153_v0  ;;  %3851 = vmatprep.subr.mxu1 %v4088_v1  ;;  %s4175_s12 = scalar_lea.vmem %s4742_s0, %s3762_s9  ;;  %vm438_vm6 = vcmask 31744   ;;  %vm734_vm7 = vcmask 60416   ;;  %s4404_s23 = scalar_lea.vmem %s4747_s5, %s3763_s20  ;;  %vm695_vm8 = vcmask 57344   ;;  %vm335_vm9 = vcmask 7168  }
   0xf   : > { %3846 = vmatprep.subr.mxu0 %v4088_v1  ;;  %3853 = vmatprep.mubr.msk.f32.mxu1 %vm4089_vm0, %v4088_v1  ;;  %v344_v3 = vld [vmem:[%s4175_s12] sm:$0x1]  ;;  %v345_v4 = vld [vmem:[%s4175_s12 + $0x8] sm:$0x1]  ;;  %v346_v5 = vld [vmem:[%s4175_s12 + $0x10] sm:$0x1] }
  0x10   : > { %3847 = vmatpush3.msra.mxu0 %v4159_v2  ;;  %v347_v6 = vld [vmem:[%s4175_s12 + $0x18] sm:$0x1]  ;;  %v348_v7 = vmax.f32 %v344_v3, 0.0  ;;  %v349_v8 = vmax.f32 %v345_v4, 0.0  ;;  %v350_v9 = vmax.f32 %v346_v5, 0.0  ;;  %s3678_s30 = sshll.u32 %s4755_s24, 3 }
  0x11   : > { %3863 = vmatprep.subr.mxu0 %v4088_v1  ;;  %v351_v10 = vmax.f32 %v347_v6, 0.0  ;;  %v753_v11 = vld [vmem:[%s4175_s12 + $0x1] sm:$0x1]  ;;  %v754_v12 = vld [vmem:[%s4175_s12 + $0x9] sm:$0x1]  ;;  %s4691_s10 = scalar_lea.vmem %s4748_s6, %s3678_s30  ;;  %vm3513_vm10 = vcmask 3072  }
  0x12   : > { %v356_v13 = vrot.slane %v349_v8, 7  ;;  %v359_v14 = vrot.slane %v350_v9, 6  ;;  %v755_v15 = vld [vmem:[%s4175_s12 + $0x11] sm:$0x1]  ;;  %v756_v16 = vld [vmem:[%s4175_s12 + $0x19] sm:$0x1] }
  0x13   : > { %v362_v17 = vrot.slane %v351_v10, 5  ;;  %v757_v18 = vmax.f32 %v753_v11, 0.0  ;;  %v758_v19 = vmax.f32 %v754_v12, 0.0  ;;  %v759_v20 = vmax.f32 %v755_v15, 0.0  ;;  %v1147_v21 = vld [vmem:[%s4175_s12 + $0x2] sm:$0x1] }
  0x14   : > { %v358_v22 = vsel %vm357_vm1, %v356_v13, %v348_v7  ;;  %v760_v23 = vmax.f32 %v756_v16, 0.0  ;;  %v1148_v24 = vld [vmem:[%s4175_s12 + $0xa] sm:$0x1]  ;;  %v1149_v25 = vld [vmem:[%s4175_s12 + $0x12] sm:$0x1]  ;;  %v1151_v26 = vmax.f32 %v1147_v21, 0.0 }
  0x15   : > { %v361_v27 = vsel %vm360_vm2, %v359_v14, %v358_v22  ;;  %v765_v28 = vrot.slane %v758_v19, 7  ;;  %v767_v29 = vrot.slane %v759_v20, 6  ;;  %v1150_v30 = vld [vmem:[%s4175_s12 + $0x1a] sm:$0x1]  ;;  %v1152_v31 = vmax.f32 %v1148_v24, 0.0  ;;  %336 = vst.msk [vmem:[%s4691_s10] sm:$0xff] %vm335_vm9, %v4088_v1 }
  0x16   : > { %v364_v32 = vsel %vm363_vm3, %v362_v17, %v361_v27  ;;  %v769_v33 = vrot.slane %v760_v23, 5  ;;  %v1153_v34 = vmax.f32 %v1149_v25, 0.0  ;;  %v1154_v35 = vmax.f32 %v1150_v30, 0.0  ;;  %v1541_v36 = vld [vmem:[%s4175_s12 + $0x3] sm:$0x1] }
  0x17   : > { %3849 = vmatmul.mubr.msk.f32.vlgmr.msra.gmra.mxu0 %vm365_vm4, %v364_v32  ;;  %516 = vrot.lane.b32.xlu0 %v364_v32, %s4090_s13  ;;  %v766_v37 = vsel %vm357_vm1, %v765_v28, %v757_v18  ;;  %v1159_v38 = vrot.slane %v1152_v31, 7  ;;  %v1542_v39 = vld [vmem:[%s4175_s12 + $0xb] sm:$0x1]  ;;  %v1543_v40 = vld [vmem:[%s4175_s12 + $0x13] sm:$0x1]  ;;  %v1545_v41 = vmax.f32 %v1541_v36, 0.0 }
  0x18   : > { %v768_v42 = vsel %vm360_vm2, %v767_v29, %v766_v37  ;;  %v1161_v43 = vrot.slane %v1153_v34, 6  ;;  %v1163_v44 = vrot.slane %v1154_v35, 5  ;;  %v1544_v45 = vld [vmem:[%s4175_s12 + $0x1b] sm:$0x1]  ;;  %v1546_v46 = vmax.f32 %v1542_v39, 0.0  ;;  %3865 = vmatprep.mubr.msk.f32.mxu0 %vm4089_vm0, %v4088_v1 }
  0x19   : > { %v4204_v47 = vsel %vm363_vm3, %v769_v33, %v768_v42  ;;  %v1160_v48 = vsel %vm357_vm1, %v1159_v38, %v1151_v26  ;;  %v1547_v49 = vmax.f32 %v1543_v40, 0.0  ;;  %v1548_v50 = vmax.f32 %v1544_v45, 0.0  ;;  %v1935_v51 = vld [vmem:[%s4175_s12 + $0x4] sm:$0x1]  ;;  %v1936_v52 = vld [vmem:[%s4175_s12 + $0xc] sm:$0x1] }
  0x1a   : > { %v1162_v53 = vsel %vm360_vm2, %v1161_v43, %v1160_v48  ;;  %v1553_v54 = vrot.slane %v1546_v46, 7  ;;  %v1937_v55 = vld [vmem:[%s4175_s12 + $0x14] sm:$0x1]  ;;  %v1938_v56 = vld [vmem:[%s4175_s12 + $0x1c] sm:$0x1]  ;;  %v1939_v57 = vmax.f32 %v1935_v51, 0.0 }
  0x1b   : > { %916 = vrot.lane.b32.xlu0 %v4204_v47, %s4090_s13  ;;  %v4215_v58 = vsel %vm363_vm3, %v1163_v44, %v1162_v53  ;;  %v1555_v59 = vrot.slane %v1547_v49, 6  ;;  %v1557_v60 = vrot.slane %v1548_v50, 5  ;;  %v1940_v61 = vmax.f32 %v1936_v52, 0.0  ;;  %v2329_v62 = vld [vmem:[%s4175_s12 + $0x5] sm:$0x1] }
  0x1c   : > { %1310 = vrot.lane.b32.xlu1 %v4215_v58, %s4090_s13  ;;  %v1554_v63 = vsel %vm357_vm1, %v1553_v54, %v1545_v41  ;;  %v1941_v3 = vmax.f32 %v1937_v55, 0.0  ;;  %v1942_v4 = vmax.f32 %v1938_v56, 0.0  ;;  %v2330_v5 = vld [vmem:[%s4175_s12 + $0xd] sm:$0x1]  ;;  %v2331_v6 = vld [vmem:[%s4175_s12 + $0x15] sm:$0x1] }
  0x1d   : > { %v1556_v7 = vsel %vm360_vm2, %v1555_v59, %v1554_v63  ;;  %v1947_v8 = vrot.slane %v1940_v61, 7  ;;  %v2332_v9 = vld [vmem:[%s4175_s12 + $0x1d] sm:$0x1]  ;;  %v2333_v10 = vmax.f32 %v2329_v62, 0.0  ;;  %v2334_v11 = vmax.f32 %v2330_v5, 0.0 }
  0x1e   : > { %v4226_v12 = vsel %vm363_vm3, %v1557_v60, %v1556_v7  ;;  %v1949_v13 = vrot.slane %v1941_v3, 6  ;;  %v1951_v14 = vrot.slane %v1942_v4, 5  ;;  %v2335_v15 = vmax.f32 %v2331_v6, 0.0  ;;  %v2723_v16 = vld [vmem:[%s4175_s12 + $0x6] sm:$0x1] }
  0x1f   : > { %v1948_v17 = vsel %vm357_vm1, %v1947_v8, %v1939_v57  ;;  %v2336_v18 = vmax.f32 %v2332_v9, 0.0  ;;  %v2341_v19 = vrot.slane %v2334_v11, 7  ;;  %v2724_v20 = vld [vmem:[%s4175_s12 + $0xe] sm:$0x1]  ;;  %v2725_v21 = vld [vmem:[%s4175_s12 + $0x16] sm:$0x1]  ;;  %v670_v6 = vlaneseq }
  0x20   : > { %1704 = vrot.lane.b32.xlu1 %v4226_v12, %s4090_s13  ;;  %v1950_v22 = vsel %vm360_vm2, %v1949_v13, %v1948_v17  ;;  %v2343_v23 = vrot.slane %v2335_v15, 6  ;;  %v2726_v24 = vld [vmem:[%s4175_s12 + $0x1e] sm:$0x1]  ;;  %v2727_v25 = vmax.f32 %v2723_v16, 0.0  ;;  %v2728_v26 = vmax.f32 %v2724_v20, 0.0  ;;  %v4274_v57 = vld [vmem:[%s4746_s4 + $0x8] sm:$0xff] }
  0x21   : > { %v4237_v27 = vsel %vm363_vm3, %v1951_v14, %v1950_v22  ;;  %v2342_v28 = vsel %vm357_vm1, %v2341_v19, %v2333_v10  ;;  %v2345_v29 = vrot.slane %v2336_v18, 5  ;;  %v2729_v30 = vmax.f32 %v2725_v21, 0.0  ;;  %v3117_v31 = vld [vmem:[%s4175_s12 + $0x7] sm:$0x1]  ;;  %v3118_v32 = vld [vmem:[%s4175_s12 + $0xf] sm:$0x1] }
  0x22   : > { %2098 = vrot.lane.b32.xlu0 %v4237_v27, %s4090_s13  ;;  %v2344_v33 = vsel %vm360_vm2, %v2343_v23, %v2342_v28  ;;  %v2730_v34 = vmax.f32 %v2726_v24, 0.0  ;;  %v2735_v35 = vrot.slane %v2728_v26, 7  ;;  %v3119_v36 = vld [vmem:[%s4175_s12 + $0x17] sm:$0x1]  ;;  %v3120_v37 = vld [vmem:[%s4175_s12 + $0x1f] sm:$0x1]  ;;  %s4710_s12 = scalar_lea.vmem %s4749_s7, %s3678_s30 }
  0x23   : > { %v4248_v38 = vsel %vm363_vm3, %v2345_v29, %v2344_v33  ;;  %v2737_v39 = vrot.slane %v2729_v30, 6  ;;  %v3121_v40 = vmax.f32 %v3117_v31, 0.0  ;;  %v3122_v41 = vmax.f32 %v3118_v32, 0.0  ;;  %v4269_v55 = vld [vmem:[%s4743_s1] sm:$0xf]  ;;  %337 = vst.msk [vmem:[%s4710_s12] sm:$0xff] %vm335_vm9, %v4088_v1 }
  0x24   : > { %2492 = vrot.lane.b32.xlu1 %v4248_v38, %s4090_s13  ;;  %v2736_v42 = vsel %vm357_vm1, %v2735_v35, %v2727_v25  ;;  %v2739_v43 = vrot.slane %v2730_v34, 5  ;;  %v3123_v44 = vmax.f32 %v3119_v36, 0.0  ;;  %v3124_v45 = vmax.f32 %v3120_v37, 0.0  ;;  %v4283_v60 = vld [vmem:[%s4746_s4] sm:$0xff] }
  0x25   : > { %v2738_v46 = vsel %vm360_vm2, %v2737_v39, %v2736_v42  ;;  %v3129_v48 = vrot.slane %v3122_v41, 7  ;;  %v671_v8 = vshrl.u32 %v670_v6, 7  ;;  %v4410_v17 = vld [vmem:[%s4744_s2] sm:$0xf] }
  0x26   : > { %v4255_v49 = vsel %vm363_vm3, %v2739_v43, %v2738_v46  ;;  %v3131_v50 = vrot.slane %v3123_v44, 6  ;;  %v3133_v51 = vrot.slane %v3124_v45, 5 }
  0x27   : > { %2886 = vrot.lane.b32.xlu0 %v4255_v49, %s4090_s13  ;;  %v3130_v52 = vsel %vm357_vm1, %v3129_v48, %v3121_v40 }
  0x28   : > { %v3132_v53 = vsel %vm360_vm2, %v3131_v50, %v3130_v52 }
  0x29   : > { %v4262_v54 = vsel %vm363_vm3, %v3133_v51, %v3132_v53 }
  0x2a   : > { %3280 = vrot.lane.b32.xlu1 %v4262_v54, %s4090_s13 }
  0x89   : > { %v517_v61 = vpop.permute.xlu0 %516 }
  0x8d   : > { %v917_v62 = vpop.permute.xlu0 %916 }
  0x94   : > { %v2099_v63 = vpop.permute.xlu0 %2098 }
  0x99   : > { %v2887_v4 = vpop.permute.xlu0 %2886 }
  0xd7   : > { %v434_v56 = vpop.f32.mrf.mxu0 }
  0xd8   : > { %3852 = vmatpush3.msk.msra.mxu1 %vm442_vm5, %v434_v56 }
  0xd9   : > { %v3850_v59 = vpop.f32.mrf.mxu0  ;;  %3854 = vmatmul.mubr.msk.f32.vlgmr.msra.gmra.mxu1 %vm438_vm6, %v4269_v55  ;;  %3856 = vmatprep.subr.mxu1 %v4088_v1 }
  0xda   : > { %3857 = vmatpush3.msra.mxu1 %v4274_v57  ;;  %3860 = vmatprep.mubr.msk.f32.mxu1 %vm4089_vm0, %v4088_v1 }
  0xdb   : > { %3858 = vmatprep.subr.mxu1 %v4088_v1 }
  0xdc   : > { %3859 = vmatpush3.msra.mxu1 %v4283_v60 }
  0xdd   : > { %3861 = vmatmul.mubr.msk.f32.vlgmr.msra.gmra.mxu1 %vm365_vm4, %v517_v61  ;;  %3868 = vmatprep.subr.mxu1 %v4088_v1 }
  0xde   : > { %3869 = vmatpush3.msra.mxu1 %v4153_v0  ;;  %3872 = vmatprep.mubr.msk.f32.mxu1 %vm4089_vm0, %v4088_v1 }
  0xdf   : > { %3870 = vmatprep.subr.mxu1 %v4088_v1 }
  0xe0   : > { %3871 = vmatpush3.msra.mxu1 %v4159_v2 }
  0xe1   : > { %3873 = vmatmul.mubr.msk.f32.vlgmr.msra.gmra.mxu1 %vm365_vm4, %v4204_v47  ;;  %3880 = vmatprep.subr.mxu1 %v4088_v1  ;;  %v1311_v47 = vpop.permute.xlu1 %1310 }
  0xe2   : > { %3881 = vmatpush3.msra.mxu1 %v4274_v57  ;;  %3884 = vmatprep.mubr.msk.f32.mxu1 %vm4089_vm0, %v4088_v1 }
  0xe3   : > { %3882 = vmatprep.subr.mxu1 %v4088_v1 }
  0xe4   : > { %3883 = vmatpush3.msra.mxu1 %v4283_v60 }
  0xe5   : > { %3885 = vmatmul.mubr.msk.f32.vlgmr.msra.gmra.mxu1 %vm365_vm4, %v917_v62  ;;  %3892 = vmatprep.subr.mxu1 %v4088_v1 }
  0xe6   : > { %3893 = vmatpush3.msra.mxu1 %v4153_v0  ;;  %3896 = vmatprep.mubr.msk.f32.mxu1 %vm4089_vm0, %v4088_v1 }
  0xe7   : > { %3894 = vmatprep.subr.mxu1 %v4088_v1 }
  0xe8   : > { %3895 = vmatpush3.msra.mxu1 %v4159_v2 }
  0xe9   : > { %3897 = vmatmul.mubr.msk.f32.vlgmr.msra.gmra.mxu1 %vm365_vm4, %v4215_v58  ;;  %3904 = vmatprep.subr.mxu1 %v4088_v1  ;;  %v1705_v58 = vpop.permute.xlu1 %1704 }
  0xea   : > { %3905 = vmatpush3.msra.mxu1 %v4274_v57  ;;  %3908 = vmatprep.mubr.msk.f32.mxu1 %vm4089_vm0, %v4088_v1 }
  0xeb   : > { %3906 = vmatprep.subr.mxu1 %v4088_v1 }
  0xec   : > { %3907 = vmatpush3.msra.mxu1 %v4283_v60 }
  0xed   : > { %3909 = vmatmul.mubr.msk.f32.vlgmr.msra.gmra.mxu1 %vm365_vm4, %v1311_v47  ;;  %3916 = vmatprep.subr.mxu1 %v4088_v1  ;;  %v2493_v3 = vpop.permute.xlu1 %2492 }
  0xee   : > { %3917 = vmatpush3.msra.mxu1 %v4153_v0  ;;  %3920 = vmatprep.mubr.msk.f32.mxu1 %vm4089_vm0, %v4088_v1 }
  0xef   : > { %3918 = vmatprep.subr.mxu1 %v4088_v1 }
  0xf0   : > { %3919 = vmatpush3.msra.mxu1 %v4159_v2 }
  0xf1   : > { %3921 = vmatmul.mubr.msk.f32.vlgmr.msra.gmra.mxu1 %vm365_vm4, %v4226_v12  ;;  %3928 = vmatprep.subr.mxu1 %v4088_v1  ;;  %v3281_v5 = vpop.permute.xlu1 %3280 }
  0xf2   : > { %3929 = vmatpush3.msra.mxu1 %v4274_v57  ;;  %3932 = vmatprep.mubr.msk.f32.mxu1 %vm4089_vm0, %v4088_v1 }
  0xf3   : > { %3930 = vmatprep.subr.mxu1 %v4088_v1 }
  0xf4   : > { %3931 = vmatpush3.msra.mxu1 %v4283_v60 }
  0xf5   : > { %3933 = vmatmul.mubr.msk.f32.vlgmr.msra.gmra.mxu1 %vm365_vm4, %v1705_v58  ;;  %3940 = vmatprep.subr.mxu1 %v4088_v1 }
  0xf6   : > { %3941 = vmatpush3.msra.mxu1 %v4153_v0  ;;  %3944 = vmatprep.mubr.msk.f32.mxu1 %vm4089_vm0, %v4088_v1 }
  0xf7   : > { %3942 = vmatprep.subr.mxu1 %v4088_v1 }
  0xf8   : > { %3943 = vmatpush3.msra.mxu1 %v4159_v2 }
  0xf9   : > { %3945 = vmatmul.mubr.msk.f32.vlgmr.msra.gmra.mxu1 %vm365_vm4, %v4237_v27  ;;  %3952 = vmatprep.subr.mxu1 %v4088_v1 }
  0xfa   : > { %3953 = vmatpush3.msra.mxu1 %v4274_v57  ;;  %3956 = vmatprep.mubr.msk.f32.mxu1 %vm4089_vm0, %v4088_v1 }
  0xfb   : > { %3954 = vmatprep.subr.mxu1 %v4088_v1 }
  0xfc   : > { %3955 = vmatpush3.msra.mxu1 %v4283_v60 }
  0xfd   : > { %3957 = vmatmul.mubr.msk.f32.vlgmr.msra.gmra.mxu1 %vm365_vm4, %v2099_v63  ;;  %3964 = vmatprep.subr.mxu1 %v4088_v1 }
  0xfe   : > { %3965 = vmatpush3.msra.mxu1 %v4153_v0  ;;  %3968 = vmatprep.mubr.msk.f32.mxu1 %vm4089_vm0, %v4088_v1 }
  0xff   : > { %3966 = vmatprep.subr.mxu1 %v4088_v1 }
 0x100   : > { %3967 = vmatpush3.msra.mxu1 %v4159_v2 }
 0x101   : > { %3969 = vmatmul.mubr.msk.f32.vlgmr.msra.gmra.mxu1 %vm365_vm4, %v4248_v38  ;;  %3976 = vmatprep.subr.mxu1 %v4088_v1 }
 0x102   : > { %3977 = vmatpush3.msra.mxu1 %v4274_v57  ;;  %3980 = vmatprep.mubr.msk.f32.mxu1 %vm4089_vm0, %v4088_v1 }
 0x103   : > { %3978 = vmatprep.subr.mxu1 %v4088_v1 }
 0x104   : > { %3979 = vmatpush3.msra.mxu1 %v4283_v60 }
 0x105   : > { %3981 = vmatmul.mubr.msk.f32.vlgmr.msra.gmra.mxu1 %vm365_vm4, %v2493_v3  ;;  %3988 = vmatprep.subr.mxu1 %v4088_v1 }
 0x106   : > { %3989 = vmatpush3.msra.mxu1 %v4153_v0  ;;  %3992 = vmatprep.mubr.msk.f32.mxu1 %vm4089_vm0, %v4088_v1 }
 0x107   : > { %3990 = vmatprep.subr.mxu1 %v4088_v1 }
 0x108   : > { %3991 = vmatpush3.msra.mxu1 %v4159_v2 }
 0x109   : > { %3993 = vmatmul.mubr.msk.f32.vlgmr.msra.gmra.mxu1 %vm365_vm4, %v4255_v49  ;;  %4000 = vmatprep.subr.mxu1 %v4088_v1 }
 0x10a   : > { %4001 = vmatpush3.msra.mxu1 %v4274_v57  ;;  %4004 = vmatprep.mubr.msk.f32.mxu1 %vm4089_vm0, %v4088_v1 }
 0x10b   : > { %4002 = vmatprep.subr.mxu1 %v4088_v1 }
 0x10c   : > { %4003 = vmatpush3.msra.mxu1 %v4283_v60 }
 0x10d   : > { %4005 = vmatmul.mubr.msk.f32.vlgmr.msra.gmra.mxu1 %vm365_vm4, %v2887_v4  ;;  %4012 = vmatprep.subr.mxu1 %v4088_v1 }
 0x10e   : > { %4013 = vmatpush3.msra.mxu1 %v4153_v0  ;;  %4016 = vmatprep.mubr.msk.f32.mxu1 %vm4089_vm0, %v4088_v1  ;;  %v4091_v0 = vmov 1966171168  }
 0x10f   : > { %4014 = vmatprep.subr.mxu1 %v4088_v1 }
 0x110   : > { %4015 = vmatpush3.msra.mxu1 %v4159_v2  ;;  %v668_v2 = vunpack.c.l.s4 %v4091_v0 }
 0x111   : > { %4017 = vmatmul.mubr.msk.f32.vlgmr.msra.gmra.mxu1 %vm365_vm4, %v4262_v54  ;;  %4024 = vmatprep.subr.mxu1 %v4088_v1 }
 0x112   : > { %4025 = vmatpush3.msra.mxu1 %v4274_v57  ;;  %4028 = vmatprep.mubr.msk.f32.mxu1 %vm4089_vm0, %v4088_v1  ;;  %v669_v7 = vunpack.c.0.s8 %v668_v2 }
 0x113   : > { %4026 = vmatprep.subr.mxu1 %v4088_v1 }
 0x114   : > { %4027 = vmatpush3.msra.mxu1 %v4283_v60  ;;  %v4396_v9 = vsub.s32 %v669_v7, %v671_v8 }
 0x115   : > { %4029 = vmatmul.mubr.msk.f32.vlgmr.msra.gmra.mxu1 %vm365_vm4, %v3281_v5 }
 0x199   : > { %v512_v10 = vpop.f32.mrf.mxu1 }
 0x19a   : > { %v673_v11 = vrot.slane %v512_v10, %v4396_v9  ;;  %v735_v12 = vsel %vm734_vm7, %v512_v10, 0.0  ;;  %v743_v13 = vmul.f32 %v512_v10, %v512_v10 }
 0x19b   : > { %736 = vadd.xlane.f32.xlu0 %v735_v12  ;;  %v3855_v14 = vpop.f32.mrf.mxu1 }
 0x19c   : > { %v674_v15 = vcombine.high %v673_v11, %v673_v11  ;;  %v681_v16 = vrot.slane %v673_v11, %v4396_v9  ;;  %v744_v21 = vsel %vm734_vm7, %v743_v13, 0.0 }
 0x19d   : > { %v586_v18 = vpop.f32.mrf.mxu1 }
 0x19e   : > { %v688_v19 = vrot.slane %v674_v15, %v4396_v9  ;;  %v689_v20 = vcombine.high %v681_v16, %v681_v16  ;;  %696 = vst.msk [vmem:[%s4404_s23] sm:$0x1] %vm695_vm8, %v681_v16  ;;  %3864 = vmatpush3.msk.msra.mxu0 %vm442_vm5, %v586_v18 }
 0x19f   : > { %745 = vadd.xlane.f32.xlu0 %v744_v21  ;;  %v3862_v22 = vpop.f32.mrf.mxu1  ;;  %3866 = vmatmul.mubr.msk.f32.vlgmr.msra.gmra.mxu0 %vm438_vm6, %v4410_v17 }
 0x1a0   : > { %v690_v23 = vcombine.high %v688_v19, %v688_v19  ;;  %697 = vst.msk [vmem:[%s4404_s23 + $0x8] sm:$0x1] %vm695_vm8, %v688_v19  ;;  %698 = vst.msk [vmem:[%s4404_s23 + $0x10] sm:$0x1] %vm695_vm8, %v689_v20  ;;  %3875 = vmatprep.subr.mxu0 %v4088_v1  ;;  %3877 = vmatprep.mubr.msk.f32.mxu0 %vm4089_vm0, %v4088_v1 }
 0x1a1   : > { %v839_v24 = vpop.f32.mrf.mxu1 }
 0x1a2   : > { %699 = vst.msk [vmem:[%s4404_s23 + $0x18] sm:$0x1] %vm695_vm8, %v690_v23  ;;  %3876 = vmatpush3.msk.msra.mxu0 %vm442_vm5, %v839_v24 }
 0x1a3   : > { %v3874_v25 = vpop.f32.mrf.mxu1  ;;  %3878 = vmatmul.mubr.msk.f32.vlgmr.msra.gmra.mxu0 %vm438_vm6, %v4269_v55  ;;  %3887 = vmatprep.subr.mxu0 %v4088_v1 }
 0x1a4   : > { %3889 = vmatprep.mubr.msk.f32.mxu0 %vm4089_vm0, %v4088_v1 }
 0x1a5   : > { %v986_v26 = vpop.f32.mrf.mxu1 }
 0x1a6   : > { %3888 = vmatpush3.msk.msra.mxu0 %vm442_vm5, %v986_v26 }
 0x1a7   : > { %v3886_v27 = vpop.f32.mrf.mxu1  ;;  %3890 = vmatmul.mubr.msk.f32.vlgmr.msra.gmra.mxu0 %vm438_vm6, %v4410_v17  ;;  %3899 = vmatprep.subr.mxu0 %v4088_v1 }
 0x1a8   : > { %3901 = vmatprep.mubr.msk.f32.mxu0 %vm4089_vm0, %v4088_v1 }
 0x1a9   : > { %v1233_v28 = vpop.f32.mrf.mxu1 }
 0x1aa   : > { %3900 = vmatpush3.msk.msra.mxu0 %vm442_vm5, %v1233_v28 }
 0x1ab   : > { %v3898_v29 = vpop.f32.mrf.mxu1  ;;  %3902 = vmatmul.mubr.msk.f32.vlgmr.msra.gmra.mxu0 %vm438_vm6, %v4269_v55  ;;  %3911 = vmatprep.subr.mxu0 %v4088_v1 }
 0x1ac   : > { %3913 = vmatprep.mubr.msk.f32.mxu0 %vm4089_vm0, %v4088_v1 }
 0x1ad   : > { %v1380_v30 = vpop.f32.mrf.mxu1 }
 0x1ae   : > { %3912 = vmatpush3.msk.msra.mxu0 %vm442_vm5, %v1380_v30 }
 0x1af   : > { %v3910_v31 = vpop.f32.mrf.mxu1  ;;  %3914 = vmatmul.mubr.msk.f32.vlgmr.msra.gmra.mxu0 %vm438_vm6, %v4410_v17  ;;  %3923 = vmatprep.subr.mxu0 %v4088_v1 }
 0x1b0   : > { %3925 = vmatprep.mubr.msk.f32.mxu0 %vm4089_vm0, %v4088_v1 }
 0x1b1   : > { %v1627_v32 = vpop.f32.mrf.mxu1 }
 0x1b2   : > { %3924 = vmatpush3.msk.msra.mxu0 %vm442_vm5, %v1627_v32 }
 0x1b3   : > { %v3922_v33 = vpop.f32.mrf.mxu1  ;;  %3926 = vmatmul.mubr.msk.f32.vlgmr.msra.gmra.mxu0 %vm438_vm6, %v4269_v55  ;;  %3935 = vmatprep.subr.mxu0 %v4088_v1 }
 0x1b4   : > { %3937 = vmatprep.mubr.msk.f32.mxu0 %vm4089_vm0, %v4088_v1 }
 0x1b5   : > { %v1774_v34 = vpop.f32.mrf.mxu1 }
 0x1b6   : > { %3936 = vmatpush3.msk.msra.mxu0 %vm442_vm5, %v1774_v34 }
 0x1b7   : > { %v3934_v35 = vpop.f32.mrf.mxu1  ;;  %3938 = vmatmul.mubr.msk.f32.vlgmr.msra.gmra.mxu0 %vm438_vm6, %v4410_v17  ;;  %3947 = vmatprep.subr.mxu0 %v4088_v1 }
 0x1b8   : > { %3949 = vmatprep.mubr.msk.f32.mxu0 %vm4089_vm0, %v4088_v1 }
 0x1b9   : > { %v2021_v36 = vpop.f32.mrf.mxu1 }
 0x1ba   : > { %3948 = vmatpush3.msk.msra.mxu0 %vm442_vm5, %v2021_v36 }
 0x1bb   : > { %v3946_v37 = vpop.f32.mrf.mxu1  ;;  %3950 = vmatmul.mubr.msk.f32.vlgmr.msra.gmra.mxu0 %vm438_vm6, %v4269_v55  ;;  %3959 = vmatprep.subr.mxu0 %v4088_v1 }
 0x1bc   : > { %3961 = vmatprep.mubr.msk.f32.mxu0 %vm4089_vm0, %v4088_v1 }
 0x1bd   : > { %v2168_v38 = vpop.f32.mrf.mxu1 }
 0x1be   : > { %3960 = vmatpush3.msk.msra.mxu0 %vm442_vm5, %v2168_v38 }
 0x1bf   : > { %v3958_v39 = vpop.f32.mrf.mxu1  ;;  %3962 = vmatmul.mubr.msk.f32.vlgmr.msra.gmra.mxu0 %vm438_vm6, %v4410_v17  ;;  %3971 = vmatprep.subr.mxu0 %v4088_v1 }
 0x1c0   : > { %3973 = vmatprep.mubr.msk.f32.mxu0 %vm4089_vm0, %v4088_v1 }
 0x1c1   : > { %v2415_v40 = vpop.f32.mrf.mxu1 }
 0x1c2   : > { %3972 = vmatpush3.msk.msra.mxu0 %vm442_vm5, %v2415_v40 }
 0x1c3   : > { %v3970_v41 = vpop.f32.mrf.mxu1  ;;  %3974 = vmatmul.mubr.msk.f32.vlgmr.msra.gmra.mxu0 %vm438_vm6, %v4269_v55  ;;  %3983 = vmatprep.subr.mxu0 %v4088_v1 }
 0x1c4   : > { %3985 = vmatprep.mubr.msk.f32.mxu0 %vm4089_vm0, %v4088_v1 }
 0x1c5   : > { %v2562_v42 = vpop.f32.mrf.mxu1 }
 0x1c6   : > { %3984 = vmatpush3.msk.msra.mxu0 %vm442_vm5, %v2562_v42 }
 0x1c7   : > { %v3982_v43 = vpop.f32.mrf.mxu1  ;;  %3986 = vmatmul.mubr.msk.f32.vlgmr.msra.gmra.mxu0 %vm438_vm6, %v4410_v17  ;;  %3995 = vmatprep.subr.mxu0 %v4088_v1 }
 0x1c8   : > { %3997 = vmatprep.mubr.msk.f32.mxu0 %vm4089_vm0, %v4088_v1 }
 0x1c9   : > { %v2809_v44 = vpop.f32.mrf.mxu1 }
 0x1ca   : > { %3996 = vmatpush3.msk.msra.mxu0 %vm442_vm5, %v2809_v44 }
 0x1cb   : > { %v3994_v45 = vpop.f32.mrf.mxu1  ;;  %3998 = vmatmul.mubr.msk.f32.vlgmr.msra.gmra.mxu0 %vm438_vm6, %v4269_v55  ;;  %4007 = vmatprep.subr.mxu0 %v4088_v1 }
 0x1cc   : > { %4009 = vmatprep.mubr.msk.f32.mxu0 %vm4089_vm0, %v4088_v1 }
 0x1cd   : > { %v2956_v46 = vpop.f32.mrf.mxu1 }
 0x1ce   : > { %4008 = vmatpush3.msk.msra.mxu0 %vm442_vm5, %v2956_v46 }
 0x1cf   : > { %v4006_v48 = vpop.f32.mrf.mxu1  ;;  %4010 = vmatmul.mubr.msk.f32.vlgmr.msra.gmra.mxu0 %vm438_vm6, %v4410_v17  ;;  %4019 = vmatprep.subr.mxu0 %v4088_v1 }
 0x1d0   : > { %4021 = vmatprep.mubr.msk.f32.mxu0 %vm4089_vm0, %v4088_v1 }
 0x1d1   : > { %v3203_v49 = vpop.f32.mrf.mxu1 }
 0x1d2   : > { %4020 = vmatpush3.msk.msra.mxu0 %vm442_vm5, %v3203_v49 }
 0x1d3   : > { %v4018_v50 = vpop.f32.mrf.mxu1  ;;  %4022 = vmatmul.mubr.msk.f32.vlgmr.msra.gmra.mxu0 %vm438_vm6, %v4269_v55  ;;  %4031 = vmatprep.subr.mxu0 %v4088_v1 }
 0x1d4   : > { %4033 = vmatprep.mubr.msk.f32.mxu0 %vm4089_vm0, %v4088_v1 }
 0x1d5   : > { %v3350_v51 = vpop.f32.mrf.mxu1 }
 0x1d6   : > { %4032 = vmatpush3.msk.msra.mxu0 %vm442_vm5, %v3350_v51 }
 0x1d7   : > { %v4030_v52 = vpop.f32.mrf.mxu1  ;;  %4034 = vmatmul.mubr.msk.f32.vlgmr.msra.gmra.mxu0 %vm438_vm6, %v4410_v17 }
 0x25f   : > { %v662_v53 = vpop.f32.mrf.mxu0 }
 0x260   : > { %v707_v54 = vrot.slane %v662_v53, %v4396_v9  ;;  %v739_v56 = vsel %vm734_vm7, %v662_v53, 0.0  ;;  %v748_v57 = vmul.f32 %v662_v53, %v662_v53 }
 0x261   : > { %740 = vadd.xlane.f32.xlu1 %v739_v56  ;;  %v3867_v55 = vpop.f32.mrf.mxu0 }
 0x262   : > { %v708_v59 = vcombine.high %v707_v54, %v707_v54  ;;  %v715_v60 = vrot.slane %v707_v54, %v4396_v9  ;;  %v749_v61 = vsel %vm734_vm7, %v748_v57, 0.0 }
 0x263   : > { %v912_v62 = vpop.f32.mrf.mxu0  ;;  %750 = vadd.xlane.f32.xlu0 %v749_v61 }
 0x264   : > { %v722_v47 = vrot.slane %v708_v59, %v4396_v9  ;;  %v723_v58 = vcombine.high %v715_v60, %v715_v60  ;;  %3686 = vst.msk [vmem:[%s4404_s23 + $0x20] sm:$0x1] %vm695_vm8, %v715_v60  ;;  %v1070_v63 = vrot.slane %v912_v62, %v4396_v9  ;;  %v1129_v3 = vsel %vm734_vm7, %v912_v62, 0.0 }
 0x265   : > { %1130 = vadd.xlane.f32.xlu1 %v1129_v3  ;;  %v3879_v4 = vpop.f32.mrf.mxu0  ;;  %v1137_v5 = vmul.f32 %v912_v62, %v912_v62 }
 0x266   : > { %v724_v0 = vcombine.high %v722_v47, %v722_v47  ;;  %3687 = vst.msk [vmem:[%s4404_s23 + $0x28] sm:$0x1] %vm695_vm8, %v722_v47  ;;  %3688 = vst.msk [vmem:[%s4404_s23 + $0x30] sm:$0x1] %vm695_vm8, %v723_v58  ;;  %v1071_v2 = vcombine.high %v1070_v63, %v1070_v63  ;;  %v1078_v6 = vrot.slane %v1070_v63, %v4396_v9 }
 0x267   : > { %v1059_v7 = vpop.f32.mrf.mxu0  ;;  %v1138_v8 = vsel %vm734_vm7, %v1137_v5, 0.0 }
 0x268   : > { %3689 = vst.msk [vmem:[%s4404_s23 + $0x38] sm:$0x1] %vm695_vm8, %v724_v0  ;;  %v1085_v10 = vrot.slane %v1071_v2, %v4396_v9  ;;  %v1086_v11 = vcombine.high %v1078_v6, %v1078_v6  ;;  %1092 = vst.msk [vmem:[%s4404_s23 + $0x1] sm:$0x1] %vm695_vm8, %v1078_v6  ;;  %v1103_v12 = vrot.slane %v1059_v7, %v4396_v9  ;;  %v1133_v13 = vsel %vm734_vm7, %v1059_v7, 0.0 }
 0x269   : > { %1139 = vadd.xlane.f32.xlu1 %v1138_v8  ;;  %1134 = vadd.xlane.f32.xlu0 %v1133_v13  ;;  %v3891_v14 = vpop.f32.mrf.mxu0  ;;  %v1142_v15 = vmul.f32 %v1059_v7, %v1059_v7 }
 0x26a   : > { %v1087_v16 = vcombine.high %v1085_v10, %v1085_v10  ;;  %1093 = vst.msk [vmem:[%s4404_s23 + $0x9] sm:$0x1] %vm695_vm8, %v1085_v10  ;;  %1094 = vst.msk [vmem:[%s4404_s23 + $0x11] sm:$0x1] %vm695_vm8, %v1086_v11  ;;  %v1104_v17 = vcombine.high %v1103_v12, %v1103_v12  ;;  %v1111_v18 = vrot.slane %v1103_v12, %v4396_v9 }
 0x26b   : > { %v1306_v19 = vpop.f32.mrf.mxu0  ;;  %v1143_v20 = vsel %vm734_vm7, %v1142_v15, 0.0 }
 0x26c   : > { %1095 = vst.msk [vmem:[%s4404_s23 + $0x19] sm:$0x1] %vm695_vm8, %v1087_v16  ;;  %v1118_v21 = vrot.slane %v1104_v17, %v4396_v9  ;;  %v1119_v22 = vcombine.high %v1111_v18, %v1111_v18  ;;  %3696 = vst.msk [vmem:[%s4404_s23 + $0x21] sm:$0x1] %vm695_vm8, %v1111_v18  ;;  %v1464_v23 = vrot.slane %v1306_v19, %v4396_v9  ;;  %v1523_v24 = vsel %vm734_vm7, %v1306_v19, 0.0 }
 0x26d   : > { %1144 = vadd.xlane.f32.xlu0 %v1143_v20  ;;  %1524 = vadd.xlane.f32.xlu1 %v1523_v24  ;;  %v3903_v25 = vpop.f32.mrf.mxu0  ;;  %v1531_v26 = vmul.f32 %v1306_v19, %v1306_v19 }
 0x26e   : > { %v1120_v27 = vcombine.high %v1118_v21, %v1118_v21  ;;  %3697 = vst.msk [vmem:[%s4404_s23 + $0x29] sm:$0x1] %vm695_vm8, %v1118_v21  ;;  %3698 = vst.msk [vmem:[%s4404_s23 + $0x31] sm:$0x1] %vm695_vm8, %v1119_v22  ;;  %v1465_v28 = vcombine.high %v1464_v23, %v1464_v23  ;;  %v1472_v29 = vrot.slane %v1464_v23, %v4396_v9 }
 0x26f   : > { %v1453_v30 = vpop.f32.mrf.mxu0  ;;  %v1532_v31 = vsel %vm734_vm7, %v1531_v26, 0.0 }
 0x270   : > { %3699 = vst.msk [vmem:[%s4404_s23 + $0x39] sm:$0x1] %vm695_vm8, %v1120_v27  ;;  %v1479_v32 = vrot.slane %v1465_v28, %v4396_v9  ;;  %v1480_v33 = vcombine.high %v1472_v29, %v1472_v29  ;;  %1486 = vst.msk [vmem:[%s4404_s23 + $0x2] sm:$0x1] %vm695_vm8, %v1472_v29  ;;  %v1497_v34 = vrot.slane %v1453_v30, %v4396_v9  ;;  %v1527_v35 = vsel %vm734_vm7, %v1453_v30, 0.0 }
 0x271   : > { %1533 = vadd.xlane.f32.xlu1 %v1532_v31  ;;  %1528 = vadd.xlane.f32.xlu0 %v1527_v35  ;;  %v3915_v36 = vpop.f32.mrf.mxu0  ;;  %v1536_v37 = vmul.f32 %v1453_v30, %v1453_v30 }
 0x272   : > { %v1481_v38 = vcombine.high %v1479_v32, %v1479_v32  ;;  %1487 = vst.msk [vmem:[%s4404_s23 + $0xa] sm:$0x1] %vm695_vm8, %v1479_v32  ;;  %1488 = vst.msk [vmem:[%s4404_s23 + $0x12] sm:$0x1] %vm695_vm8, %v1480_v33  ;;  %v1498_v39 = vcombine.high %v1497_v34, %v1497_v34  ;;  %v1505_v40 = vrot.slane %v1497_v34, %v4396_v9 }
 0x273   : > { %v1700_v41 = vpop.f32.mrf.mxu0  ;;  %v1537_v42 = vsel %vm734_vm7, %v1536_v37, 0.0 }
 0x274   : > { %1489 = vst.msk [vmem:[%s4404_s23 + $0x1a] sm:$0x1] %vm695_vm8, %v1481_v38  ;;  %v1512_v43 = vrot.slane %v1498_v39, %v4396_v9  ;;  %v1513_v44 = vcombine.high %v1505_v40, %v1505_v40  ;;  %3706 = vst.msk [vmem:[%s4404_s23 + $0x22] sm:$0x1] %vm695_vm8, %v1505_v40  ;;  %v1858_v45 = vrot.slane %v1700_v41, %v4396_v9  ;;  %v1917_v46 = vsel %vm734_vm7, %v1700_v41, 0.0 }
 0x275   : > { %1538 = vadd.xlane.f32.xlu0 %v1537_v42  ;;  %1918 = vadd.xlane.f32.xlu1 %v1917_v46  ;;  %v3927_v48 = vpop.f32.mrf.mxu0  ;;  %v1925_v49 = vmul.f32 %v1700_v41, %v1700_v41 }
 0x276   : > { %v1514_v50 = vcombine.high %v1512_v43, %v1512_v43  ;;  %3707 = vst.msk [vmem:[%s4404_s23 + $0x2a] sm:$0x1] %vm695_vm8, %v1512_v43  ;;  %3708 = vst.msk [vmem:[%s4404_s23 + $0x32] sm:$0x1] %vm695_vm8, %v1513_v44  ;;  %v1859_v51 = vcombine.high %v1858_v45, %v1858_v45  ;;  %v1866_v52 = vrot.slane %v1858_v45, %v4396_v9 }
 0x277   : > { %v1847_v53 = vpop.f32.mrf.mxu0  ;;  %v1926_v54 = vsel %vm734_vm7, %v1925_v49, 0.0 }
 0x278   : > { %3709 = vst.msk [vmem:[%s4404_s23 + $0x3a] sm:$0x1] %vm695_vm8, %v1514_v50  ;;  %v1873_v56 = vrot.slane %v1859_v51, %v4396_v9  ;;  %v1874_v57 = vcombine.high %v1866_v52, %v1866_v52  ;;  %1880 = vst.msk [vmem:[%s4404_s23 + $0x3] sm:$0x1] %vm695_vm8, %v1866_v52  ;;  %v1891_v55 = vrot.slane %v1847_v53, %v4396_v9  ;;  %v1921_v59 = vsel %vm734_vm7, %v1847_v53, 0.0 }
 0x279   : > { %1927 = vadd.xlane.f32.xlu1 %v1926_v54  ;;  %1922 = vadd.xlane.f32.xlu0 %v1921_v59  ;;  %v3939_v60 = vpop.f32.mrf.mxu0  ;;  %v1930_v61 = vmul.f32 %v1847_v53, %v1847_v53 }
 0x27a   : > { %v1875_v62 = vcombine.high %v1873_v56, %v1873_v56  ;;  %1881 = vst.msk [vmem:[%s4404_s23 + $0xb] sm:$0x1] %vm695_vm8, %v1873_v56  ;;  %1882 = vst.msk [vmem:[%s4404_s23 + $0x13] sm:$0x1] %vm695_vm8, %v1874_v57  ;;  %v1892_v47 = vcombine.high %v1891_v55, %v1891_v55  ;;  %v1899_v58 = vrot.slane %v1891_v55, %v4396_v9 }
 0x27b   : > { %v2094_v63 = vpop.f32.mrf.mxu0  ;;  %v1931_v3 = vsel %vm734_vm7, %v1930_v61, 0.0 }
 0x27c   : > { %1883 = vst.msk [vmem:[%s4404_s23 + $0x1b] sm:$0x1] %vm695_vm8, %v1875_v62  ;;  %v1906_v4 = vrot.slane %v1892_v47, %v4396_v9  ;;  %v1907_v5 = vcombine.high %v1899_v58, %v1899_v58  ;;  %3716 = vst.msk [vmem:[%s4404_s23 + $0x23] sm:$0x1] %vm695_vm8, %v1899_v58  ;;  %v2252_v0 = vrot.slane %v2094_v63, %v4396_v9  ;;  %v2311_v2 = vsel %vm734_vm7, %v2094_v63, 0.0 }
 0x27d   : > { %1932 = vadd.xlane.f32.xlu0 %v1931_v3  ;;  %2312 = vadd.xlane.f32.xlu1 %v2311_v2  ;;  %v3951_v6 = vpop.f32.mrf.mxu0  ;;  %v2319_v7 = vmul.f32 %v2094_v63, %v2094_v63 }
 0x27e   : > { %v1908_v8 = vcombine.high %v1906_v4, %v1906_v4  ;;  %3717 = vst.msk [vmem:[%s4404_s23 + $0x2b] sm:$0x1] %vm695_vm8, %v1906_v4  ;;  %3718 = vst.msk [vmem:[%s4404_s23 + $0x33] sm:$0x1] %vm695_vm8, %v1907_v5  ;;  %v2253_v10 = vcombine.high %v2252_v0, %v2252_v0  ;;  %v2260_v11 = vrot.slane %v2252_v0, %v4396_v9 }
 0x27f   : > { %v2241_v12 = vpop.f32.mrf.mxu0  ;;  %v2320_v13 = vsel %vm734_vm7, %v2319_v7, 0.0 }
 0x280   : > { %3719 = vst.msk [vmem:[%s4404_s23 + $0x3b] sm:$0x1] %vm695_vm8, %v1908_v8  ;;  %v2267_v14 = vrot.slane %v2253_v10, %v4396_v9  ;;  %v2268_v15 = vcombine.high %v2260_v11, %v2260_v11  ;;  %2274 = vst.msk [vmem:[%s4404_s23 + $0x4] sm:$0x1] %vm695_vm8, %v2260_v11  ;;  %v2285_v16 = vrot.slane %v2241_v12, %v4396_v9  ;;  %v2315_v17 = vsel %vm734_vm7, %v2241_v12, 0.0 }
 0x281   : > { %2321 = vadd.xlane.f32.xlu1 %v2320_v13  ;;  %2316 = vadd.xlane.f32.xlu0 %v2315_v17  ;;  %v3963_v18 = vpop.f32.mrf.mxu0  ;;  %v2324_v19 = vmul.f32 %v2241_v12, %v2241_v12 }
 0x282   : > { %v2269_v20 = vcombine.high %v2267_v14, %v2267_v14  ;;  %2275 = vst.msk [vmem:[%s4404_s23 + $0xc] sm:$0x1] %vm695_vm8, %v2267_v14  ;;  %2276 = vst.msk [vmem:[%s4404_s23 + $0x14] sm:$0x1] %vm695_vm8, %v2268_v15  ;;  %v2286_v21 = vcombine.high %v2285_v16, %v2285_v16  ;;  %v2293_v22 = vrot.slane %v2285_v16, %v4396_v9 }
 0x283   : > { %v2488_v23 = vpop.f32.mrf.mxu0  ;;  %v2325_v24 = vsel %vm734_vm7, %v2324_v19, 0.0 }
 0x284   : > { %2277 = vst.msk [vmem:[%s4404_s23 + $0x1c] sm:$0x1] %vm695_vm8, %v2269_v20  ;;  %v2300_v25 = vrot.slane %v2286_v21, %v4396_v9  ;;  %v2301_v26 = vcombine.high %v2293_v22, %v2293_v22  ;;  %3726 = vst.msk [vmem:[%s4404_s23 + $0x24] sm:$0x1] %vm695_vm8, %v2293_v22  ;;  %v2646_v27 = vrot.slane %v2488_v23, %v4396_v9  ;;  %v2705_v28 = vsel %vm734_vm7, %v2488_v23, 0.0 }
 0x285   : > { %2326 = vadd.xlane.f32.xlu0 %v2325_v24  ;;  %2706 = vadd.xlane.f32.xlu1 %v2705_v28  ;;  %v3975_v29 = vpop.f32.mrf.mxu0  ;;  %v2713_v30 = vmul.f32 %v2488_v23, %v2488_v23 }
 0x286   : > { %v2302_v31 = vcombine.high %v2300_v25, %v2300_v25  ;;  %3727 = vst.msk [vmem:[%s4404_s23 + $0x2c] sm:$0x1] %vm695_vm8, %v2300_v25  ;;  %3728 = vst.msk [vmem:[%s4404_s23 + $0x34] sm:$0x1] %vm695_vm8, %v2301_v26  ;;  %v2647_v32 = vcombine.high %v2646_v27, %v2646_v27  ;;  %v2654_v33 = vrot.slane %v2646_v27, %v4396_v9 }
 0x287   : > { %v2635_v34 = vpop.f32.mrf.mxu0  ;;  %v2714_v35 = vsel %vm734_vm7, %v2713_v30, 0.0 }
 0x288   : > { %3729 = vst.msk [vmem:[%s4404_s23 + $0x3c] sm:$0x1] %vm695_vm8, %v2302_v31  ;;  %v2661_v36 = vrot.slane %v2647_v32, %v4396_v9  ;;  %v2662_v37 = vcombine.high %v2654_v33, %v2654_v33  ;;  %2668 = vst.msk [vmem:[%s4404_s23 + $0x5] sm:$0x1] %vm695_vm8, %v2654_v33  ;;  %v2679_v38 = vrot.slane %v2635_v34, %v4396_v9  ;;  %v2709_v39 = vsel %vm734_vm7, %v2635_v34, 0.0 }
 0x289   : > { %2715 = vadd.xlane.f32.xlu1 %v2714_v35  ;;  %2710 = vadd.xlane.f32.xlu0 %v2709_v39  ;;  %v3987_v40 = vpop.f32.mrf.mxu0  ;;  %v2718_v41 = vmul.f32 %v2635_v34, %v2635_v34 }
 0x28a   : > { %v2663_v42 = vcombine.high %v2661_v36, %v2661_v36  ;;  %2669 = vst.msk [vmem:[%s4404_s23 + $0xd] sm:$0x1] %vm695_vm8, %v2661_v36  ;;  %2670 = vst.msk [vmem:[%s4404_s23 + $0x15] sm:$0x1] %vm695_vm8, %v2662_v37  ;;  %v2680_v43 = vcombine.high %v2679_v38, %v2679_v38  ;;  %v2687_v44 = vrot.slane %v2679_v38, %v4396_v9 }
 0x28b   : > { %v2882_v45 = vpop.f32.mrf.mxu0  ;;  %v2719_v46 = vsel %vm734_vm7, %v2718_v41, 0.0 }
 0x28c   : > { %2671 = vst.msk [vmem:[%s4404_s23 + $0x1d] sm:$0x1] %vm695_vm8, %v2663_v42  ;;  %v2694_v48 = vrot.slane %v2680_v43, %v4396_v9  ;;  %v2695_v49 = vcombine.high %v2687_v44, %v2687_v44  ;;  %3736 = vst.msk [vmem:[%s4404_s23 + $0x25] sm:$0x1] %vm695_vm8, %v2687_v44  ;;  %v3040_v50 = vrot.slane %v2882_v45, %v4396_v9  ;;  %v3099_v51 = vsel %vm734_vm7, %v2882_v45, 0.0 }
 0x28d   : > { %2720 = vadd.xlane.f32.xlu0 %v2719_v46  ;;  %3100 = vadd.xlane.f32.xlu1 %v3099_v51  ;;  %v3999_v52 = vpop.f32.mrf.mxu0  ;;  %v3107_v53 = vmul.f32 %v2882_v45, %v2882_v45 }
 0x28e   : > { %v2696_v54 = vcombine.high %v2694_v48, %v2694_v48  ;;  %3737 = vst.msk [vmem:[%s4404_s23 + $0x2d] sm:$0x1] %vm695_vm8, %v2694_v48  ;;  %3738 = vst.msk [vmem:[%s4404_s23 + $0x35] sm:$0x1] %vm695_vm8, %v2695_v49  ;;  %v3041_v56 = vcombine.high %v3040_v50, %v3040_v50  ;;  %v3048_v57 = vrot.slane %v3040_v50, %v4396_v9 }
 0x28f   : > { %v3029_v55 = vpop.f32.mrf.mxu0  ;;  %v3108_v59 = vsel %vm734_vm7, %v3107_v53, 0.0 }
 0x290   : > { %3739 = vst.msk [vmem:[%s4404_s23 + $0x3d] sm:$0x1] %vm695_vm8, %v2696_v54  ;;  %v3055_v60 = vrot.slane %v3041_v56, %v4396_v9  ;;  %v3056_v61 = vcombine.high %v3048_v57, %v3048_v57  ;;  %3062 = vst.msk [vmem:[%s4404_s23 + $0x6] sm:$0x1] %vm695_vm8, %v3048_v57  ;;  %v3073_v62 = vrot.slane %v3029_v55, %v4396_v9  ;;  %v3103_v47 = vsel %vm734_vm7, %v3029_v55, 0.0 }
 0x291   : > { %3109 = vadd.xlane.f32.xlu1 %v3108_v59  ;;  %3104 = vadd.xlane.f32.xlu0 %v3103_v47  ;;  %v4011_v58 = vpop.f32.mrf.mxu0  ;;  %v3112_v63 = vmul.f32 %v3029_v55, %v3029_v55 }
 0x292   : > { %v3057_v3 = vcombine.high %v3055_v60, %v3055_v60  ;;  %3063 = vst.msk [vmem:[%s4404_s23 + $0xe] sm:$0x1] %vm695_vm8, %v3055_v60  ;;  %3064 = vst.msk [vmem:[%s4404_s23 + $0x16] sm:$0x1] %vm695_vm8, %v3056_v61  ;;  %v3074_v4 = vcombine.high %v3073_v62, %v3073_v62  ;;  %v3081_v5 = vrot.slane %v3073_v62, %v4396_v9 }
 0x293   : > { %v3276_v0 = vpop.f32.mrf.mxu0  ;;  %v3113_v2 = vsel %vm734_vm7, %v3112_v63, 0.0 }
 0x294   : > { %3065 = vst.msk [vmem:[%s4404_s23 + $0x1e] sm:$0x1] %vm695_vm8, %v3057_v3  ;;  %v3088_v6 = vrot.slane %v3074_v4, %v4396_v9  ;;  %v3089_v7 = vcombine.high %v3081_v5, %v3081_v5  ;;  %3746 = vst.msk [vmem:[%s4404_s23 + $0x26] sm:$0x1] %vm695_vm8, %v3081_v5  ;;  %v3434_v8 = vrot.slane %v3276_v0, %v4396_v9  ;;  %v3493_v10 = vsel %vm734_vm7, %v3276_v0, 0.0 }
 0x295   : > { %3114 = vadd.xlane.f32.xlu0 %v3113_v2  ;;  %3494 = vadd.xlane.f32.xlu1 %v3493_v10  ;;  %v4023_v11 = vpop.f32.mrf.mxu0  ;;  %v3501_v12 = vmul.f32 %v3276_v0, %v3276_v0 }
 0x296   : > { %v3090_v13 = vcombine.high %v3088_v6, %v3088_v6  ;;  %3747 = vst.msk [vmem:[%s4404_s23 + $0x2e] sm:$0x1] %vm695_vm8, %v3088_v6  ;;  %3748 = vst.msk [vmem:[%s4404_s23 + $0x36] sm:$0x1] %vm695_vm8, %v3089_v7  ;;  %v3435_v14 = vcombine.high %v3434_v8, %v3434_v8  ;;  %v3442_v15 = vrot.slane %v3434_v8, %v4396_v9  ;;  %v3511_v11 = vld [vmem:[%s4691_s10] sm:$0xf] }
 0x297   : > { %v3423_v16 = vpop.f32.mrf.mxu0  ;;  %v3502_v17 = vsel %vm734_vm7, %v3501_v12, 0.0 }
 0x298   : > { %3749 = vst.msk [vmem:[%s4404_s23 + $0x3e] sm:$0x1] %vm695_vm8, %v3090_v13  ;;  %v3449_v18 = vrot.slane %v3435_v14, %v4396_v9  ;;  %v3450_v19 = vcombine.high %v3442_v15, %v3442_v15  ;;  %3456 = vst.msk [vmem:[%s4404_s23 + $0x7] sm:$0x1] %vm695_vm8, %v3442_v15  ;;  %v3467_v20 = vrot.slane %v3423_v16, %v4396_v9  ;;  %v3497_v21 = vsel %vm734_vm7, %v3423_v16, 0.0 }
 0x299   : > { %3503 = vadd.xlane.f32.xlu1 %v3502_v17  ;;  %3498 = vadd.xlane.f32.xlu0 %v3497_v21  ;;  %v4035_v22 = vpop.f32.mrf.mxu0  ;;  %v3506_v23 = vmul.f32 %v3423_v16, %v3423_v16  ;;  %v3518_v21 = vld [vmem:[%s4710_s12] sm:$0xf] }
 0x29a   : > { %v3451_v24 = vcombine.high %v3449_v18, %v3449_v18  ;;  %3457 = vst.msk [vmem:[%s4404_s23 + $0xf] sm:$0x1] %vm695_vm8, %v3449_v18  ;;  %3458 = vst.msk [vmem:[%s4404_s23 + $0x17] sm:$0x1] %vm695_vm8, %v3450_v19  ;;  %v3468_v25 = vcombine.high %v3467_v20, %v3467_v20  ;;  %v3475_v26 = vrot.slane %v3467_v20, %v4396_v9 }
 0x29b   : > { %v3507_v29 = vsel %vm734_vm7, %v3506_v23, 0.0  ;;  %v3515_v23 = vld [vmem:[%s4691_s10 + $0x4] sm:$0xf] }
 0x29c   : > { %3459 = vst.msk [vmem:[%s4404_s23 + $0x1f] sm:$0x1] %vm695_vm8, %v3451_v24  ;;  %v3482_v27 = vrot.slane %v3468_v25, %v4396_v9  ;;  %v3483_v28 = vcombine.high %v3475_v26, %v3475_v26  ;;  %3756 = vst.msk [vmem:[%s4404_s23 + $0x27] sm:$0x1] %vm695_vm8, %v3475_v26  ;;  %v737_v9 = vpop.xlane.xlu0 %736 }
 0x29d   : > { %3508 = vadd.xlane.f32.xlu0 %v3507_v29 }
 0x29e   : > { %v3484_v30 = vcombine.high %v3482_v27, %v3482_v27  ;;  %3757 = vst.msk [vmem:[%s4404_s23 + $0x2f] sm:$0x1] %vm695_vm8, %v3482_v27  ;;  %3758 = vst.msk [vmem:[%s4404_s23 + $0x37] sm:$0x1] %vm695_vm8, %v3483_v28 }
 0x2a0   : > { %3759 = vst.msk [vmem:[%s4404_s23 + $0x3f] sm:$0x1] %vm695_vm8, %v3484_v30  ;;  %v746_v31 = vpop.xlane.xlu0 %745 }
 0x2ea   : > { %v741_v32 = vpop.xlane.xlu1 %740 }
 0x2ec   : > { %v751_v33 = vpop.xlane.xlu0 %750 }
 0x2ee   : > { %v1131_v34 = vpop.xlane.xlu1 %1130 }
 0x2ef   : > { %v1132_v53 = vadd.f32 %v1131_v34, %v737_v9  ;;  %v3521_v9 = vld [vmem:[%s4710_s12 + $0x4] sm:$0xf] }
 0x2f2   : > { %v1140_v35 = vpop.xlane.xlu1 %1139  ;;  %v1135_v36 = vpop.xlane.xlu0 %1134 }
 0x2f3   : > { %v1141_v55 = vadd.f32 %v1140_v35, %v746_v31  ;;  %v1136_v59 = vadd.f32 %v1135_v36, %v741_v32 }
 0x2f6   : > { %v1145_v37 = vpop.xlane.xlu0 %1144  ;;  %v1525_v38 = vpop.xlane.xlu1 %1524 }
 0x2f7   : > { %v1526_v54 = vadd.f32 %v1525_v38, %v1132_v53  ;;  %v1146_v3 = vadd.f32 %v1145_v37, %v751_v33 }
 0x2fa   : > { %v1534_v39 = vpop.xlane.xlu1 %1533  ;;  %v1529_v40 = vpop.xlane.xlu0 %1528 }
 0x2fb   : > { %v1535_v61 = vadd.f32 %v1534_v39, %v1141_v55  ;;  %v1530_v62 = vadd.f32 %v1529_v40, %v1136_v59 }
 0x2fe   : > { %v1539_v41 = vpop.xlane.xlu0 %1538  ;;  %v1919_v42 = vpop.xlane.xlu1 %1918 }
 0x2ff   : > { %v1920_v60 = vadd.f32 %v1919_v42, %v1526_v54  ;;  %v1540_v2 = vadd.f32 %v1539_v41, %v1146_v3 }
 0x302   : > { %v1928_v43 = vpop.xlane.xlu1 %1927  ;;  %v1923_v44 = vpop.xlane.xlu0 %1922 }
 0x303   : > { %v1929_v4 = vadd.f32 %v1928_v43, %v1535_v61  ;;  %v1924_v5 = vadd.f32 %v1923_v44, %v1530_v62 }
 0x306   : > { %v1933_v45 = vpop.xlane.xlu0 %1932  ;;  %v2313_v46 = vpop.xlane.xlu1 %2312 }
 0x307   : > { %v2314_v47 = vadd.f32 %v2313_v46, %v1920_v60  ;;  %v1934_v13 = vadd.f32 %v1933_v45, %v1540_v2 }
 0x30a   : > { %v2322_v1 = vpop.xlane.xlu1 %2321  ;;  %v2317_v48 = vpop.xlane.xlu0 %2316 }
 0x30b   : > { %v2323_v6 = vadd.f32 %v2322_v1, %v1929_v4  ;;  %v2318_v7 = vadd.f32 %v2317_v48, %v1924_v5 }
 0x30e   : > { %v2327_v49 = vpop.xlane.xlu0 %2326  ;;  %v2707_v50 = vpop.xlane.xlu1 %2706 }
 0x30f   : > { %v2708_v0 = vadd.f32 %v2707_v50, %v2314_v47  ;;  %v2328_v17 = vadd.f32 %v2327_v49, %v1934_v13 }
 0x312   : > { %v2716_v51 = vpop.xlane.xlu1 %2715  ;;  %v2711_v52 = vpop.xlane.xlu0 %2710 }
 0x313   : > { %v2717_v14 = vadd.f32 %v2716_v51, %v2323_v6  ;;  %v2712_v15 = vadd.f32 %v2711_v52, %v2318_v7 }
 0x316   : > { %v2721_v56 = vpop.xlane.xlu0 %2720  ;;  %v3101_v57 = vpop.xlane.xlu1 %3100 }
 0x317   : > { %v3102_v8 = vadd.f32 %v3101_v57, %v2708_v0  ;;  %v2722_v25 = vadd.f32 %v2721_v56, %v2328_v17 }
 0x31a   : > { %v3110_v58 = vpop.xlane.xlu1 %3109  ;;  %v3105_v63 = vpop.xlane.xlu0 %3104 }
 0x31b   : > { %v3111_v18 = vadd.f32 %v3110_v58, %v2717_v14  ;;  %v3106_v19 = vadd.f32 %v3105_v63, %v2712_v15 }
 0x31e   : > { %v3115_v10 = vpop.xlane.xlu0 %3114  ;;  %v3495_v12 = vpop.xlane.xlu1 %3494 }
 0x31f   : > { %v3496_v16 = vadd.f32 %v3495_v12, %v3102_v8  ;;  %v3116_v28 = vadd.f32 %v3115_v10, %v2722_v25 }
 0x321   : > { %v3512_v20 = vadd.f32 %v3511_v11, %v3496_v16 }
 0x322   : > { %v3504_v22 = vpop.xlane.xlu1 %3503  ;;  %v3499_v24 = vpop.xlane.xlu0 %3498 }
 0x323   : > { %3514 = vst.msk [vmem:[%s4691_s10] sm:$0xf] %vm3513_vm10, %v3512_v20  ;;  %v3505_v26 = vadd.f32 %v3504_v22, %v3111_v18  ;;  %v3500_v27 = vadd.f32 %v3499_v24, %v3106_v19 }
 0x325   : > { %v3519_v29 = vadd.f32 %v3518_v21, %v3505_v26  ;;  %v3516_v30 = vadd.f32 %v3515_v23, %v3500_v27 }
 0x326   : > { %v3509_v31 = vpop.xlane.xlu0 %3508 }
 0x327   : > { %3520 = vst.msk [vmem:[%s4710_s12] sm:$0xf] %vm3513_vm10, %v3519_v29  ;;  %3517 = vst.msk [vmem:[%s4691_s10 + $0x4] sm:$0xf] %vm3513_vm10, %v3516_v30  ;;  %v3510_v32 = vadd.f32 %v3509_v31, %v3116_v28 }
 0x329   : > { %v3522_v33 = vadd.f32 %v3521_v9, %v3510_v32 }
 0x32b   : > { %3523 = vst.msk [vmem:[%s4710_s12 + $0x4] sm:$0xf] %vm3513_vm10, %v3522_v33 }
 0x32c PF: > { %s18_s26 = sadd.s32 1, %s4086_s26   ;;  %s4750_s24 = smov %s4082_s25 }
 0x32d   : > { %p15_p5 = scmp.ge.s32.totalorder %s18_s26, 4   ;;  %s4751_s25 = smov %s4753_s27 }
 0x32f   :  { %17 = sbr.rel (!%p15_p5) target bundleno = 2 (0x2), region = 99 }

</bundles_post_ra>
